<compile_context>
chip_gen: v7x
topology: tpu7x:2x2x1
jax: 0.10.0
libtpu: 0.0.40
codegen_flags: <defaults>
</compile_context>

<pallas_src>
import math

import jax
import jax.numpy as jnp
from jax import lax
from jax.experimental import pallas as pl
from jax.experimental.pallas import tpu as pltpu

LOG2 = math.log(2.0)


def _ssp(x):
    # numerically stable shifted softplus: log(1 + exp(x)) - log(2)
    return jnp.maximum(x, 0.0) + jnp.log(1.0 + jnp.exp(-jnp.abs(x))) - LOG2


def _round_up(x, m):
    return ((x + m - 1) // m) * m


def _pad2(a, rows, cols):
    return jnp.pad(a, ((0, rows - a.shape[0]), (0, cols - a.shape[1])))


# ----------------------------------------------------------------------------
# Fused Pallas kernel: all interaction layers + decoder
#   grid = (n_layers, n_edge_tiles)   (both sequential / "arbitrary")
# ----------------------------------------------------------------------------
def schnet_fused_kernel(idx_i_ref, idx_j_ref,                        # (1,t_e) / (t_e,1) int32
                        h0_ref, rbf_ref, cut_ref, amask_ref,         # node / edge data
                        win_ref, wf1_ref, bf1_ref, wf2_ref, bf2_ref,
                        wo1_ref, bo1_ref, wo2_ref, bo2_ref,          # per-layer weights
                        wd1_ref, bd1_ref, wd2_ref, bd2_ref,          # decoder weights
                        ac_ref,                                      # output [N_pad, 1]
                        h_sc, x_sc, m_sc):                           # VMEM scratch
    l = pl.program_id(0)
    e = pl.program_id(1)
    n_layers = pl.num_programs(0)
    n_etiles = pl.num_programs(1)
    t_e = idx_j_ref.shape[0]
    n_pad = h_sc.shape[0]

    # ---- start of a layer: x = in2f(h), zero the segment-sum accumulator ----
    @pl.when(e == 0)
    def _start_layer():
        @pl.when(l == 0)
        def _load_h0():
            h_sc[...] = h0_ref[...]

        x_sc[...] = jnp.dot(h_sc[...].astype(jnp.bfloat16), win_ref[...],
                            preferred_element_type=jnp.float32
                            ).astype(jnp.bfloat16)
        m_sc[...] = jnp.zeros_like(m_sc)

    # ---- filter network on this edge tile (MXU, lane-dense K=128) -----------
    wij = jnp.dot(rbf_ref[...], wf1_ref[...],
                  preferred_element_type=jnp.float32) + bf1_ref[...]
    wij = _ssp(wij)
    wij = jnp.dot(wij.astype(jnp.bfloat16), wf2_ref[...],
                  preferred_element_type=jnp.float32) + bf2_ref[...]
    wij = wij * cut_ref[...]            # * dist_cut; zero on masked/padded edges

    # ---- one-hot MXU gather: x_j = x[idx_j] ----------------------------------
    # onehot_j[k, n] = (idx_j[k] == n);   (t_e, n_pad) @ (n_pad, F) -> (t_e, F)
    edge_nodes = lax.broadcasted_iota(jnp.int32, (t_e, n_pad), 1)
    onehot_j = (edge_nodes == idx_j_ref[...]).astype(jnp.bfloat16)
    x_j = jnp.dot(onehot_j, x_sc[...], preferred_element_type=jnp.float32)
    x_ij = x_j * wij                    # (t_e, F) f32

    # ---- one-hot MXU segment-sum: m[idx_i] += x_ij ---------------------------
    # onehot_i_t[n, k] = (n == idx_i[k]); (n_pad, t_e) @ (t_e, F) -> (n_pad, F)
    node_edges = lax.broadcasted_iota(jnp.int32, (n_pad, t_e), 0)
    onehot_i_t = (node_edges == idx_i_ref[...]).astype(jnp.bfloat16)
    m_sc[...] += jnp.dot(onehot_i_t, x_ij.astype(jnp.bfloat16),
                         preferred_element_type=jnp.float32)

    # ---- end of layer: f2out + residual; decoder at the very end -------------
    @pl.when(e == n_etiles - 1)
    def _finish_layer():
        m = _ssp(jnp.dot(m_sc[...].astype(jnp.bfloat16), wo1_ref[...],
                         preferred_element_type=jnp.float32) + bo1_ref[...])
        m = jnp.dot(m.astype(jnp.bfloat16), wo2_ref[...],
                    preferred_element_type=jnp.float32) + bo2_ref[...]
        h_sc[...] = h_sc[...] + m

        @pl.when(l == n_layers - 1)
        def _decoder():
            hm = h_sc[...] * amask_ref[...]                 # h = h * atom_mask
            y = _ssp(jnp.dot(hm.astype(jnp.bfloat16), wd1_ref[...],
                             preferred_element_type=jnp.float32) + bd1_ref[...])
            ac = jnp.dot(y.astype(jnp.bfloat16), wd2_ref[...],
                         preferred_element_type=jnp.float32) + bd2_ref[...]
            ac_ref[...] = ac * amask_ref[...]               # ac = ac * atom_mask


# ----------------------------------------------------------------------------
# Glue: embedding table, distances, RBF, cutoff, parameter init / packing
# ----------------------------------------------------------------------------
def gaussian_rbf(radial, cutoff, n_rbf):
    offsets = jnp.linspace(0.0, cutoff, n_rbf, dtype=jnp.float32)        # [R]
    width = jnp.abs(offsets[1] - offsets[0])
    coeff = -0.5 / (width * width)
    return jnp.exp(coeff * (radial[:, None] - offsets[None, :]) ** 2)    # [E, R]


def cosine_cutoff(radial, cutoff):
    d = radial[:, None]                                                  # [E, 1]
    c = 0.5 * (jnp.cos(d * math.pi / cutoff) + 1.0)
    return c * (d < cutoff).astype(jnp.float32)


def init_params(key, n_hf, n_rbf, n_interactions, max_z):
    keys = iter(jax.random.split(key, 9 * n_interactions + 8))

    def dense(fan_in, fan_out, bias=True):
        w = jax.random.normal(next(keys), (fan_in, fan_out),
                              jnp.float32) / math.sqrt(fan_in)
        if bias:
            b = 0.01 * jax.random.normal(next(keys), (1, fan_out), jnp.float32)
            return w, b
        return (w,)

    emb = jax.random.normal(next(keys), (max_z, n_hf), jnp.float32)
    emb = emb.at[0].set(0.0)                          # padding_idx=0

    layers = []
    for _ in range(n_interactions):
        (w_in,) = dense(n_hf, n_hf, bias=False)       # in2f
        wf1, bf1 = dense(n_rbf, n_hf)                 # filter_network[0]
        wf2, bf2 = dense(n_hf, n_hf)                  # filter_network[1]
        wo1, bo1 = dense(n_hf, n_hf)                  # f2out[0]
        wo2, bo2 = dense(n_hf, n_hf)                  # f2out[1]
        layers.append((w_in, wf1, bf1, wf2, bf2, wo1, bo1, wo2, bo2))

    wd1, bd1 = dense(n_hf, n_hf // 2)                 # decoder (build_mlp)
    wd2, bd2 = dense(n_hf // 2, 1)
    return emb, layers, (wd1, bd1, wd2, bd2)


def pack_params(params, n_hf, n_rbf):
    """Zero-pad features (and the RBF dim) to 128 lanes, stack per-layer
    weights as [L, ., .], cast matmul operands to bf16 (biases stay f32)."""
    emb, layers, (wd1, bd1, wd2, bd2) = params
    fp = _round_up(n_hf, 128)
    hp = _round_up(max(n_hf // 2, 1), 128)
    rp = _round_up(n_rbf, 128)

    emb_p = _pad2(emb, emb.shape[0], fp)              # [max_z, FP] f32

    def stack(i, rows, cols, dtype):
        return jnp.stack([_pad2(lp[i], rows, cols) for lp in layers]).astype(dtype)

    win_s = stack(0, fp, fp, jnp.bfloat16)
    wf1_s = stack(1, rp, fp, jnp.bfloat16)            # K padded to 128 lanes
    bf1_s = stack(2, 1, fp, jnp.float32)
    wf2_s = stack(3, fp, fp, jnp.bfloat16)
    bf2_s = stack(4, 1, fp, jnp.float32)
    wo1_s = stack(5, fp, fp, jnp.bfloat16)
    bo1_s = stack(6, 1, fp, jnp.float32)
    wo2_s = stack(7, fp, fp, jnp.bfloat16)
    bo2_s = stack(8, 1, fp, jnp.float32)

    wd1_p = _pad2(wd1, fp, hp).astype(jnp.bfloat16)
    bd1_p = _pad2(bd1, 1, hp).astype(jnp.float32)
    wd2_p = _pad2(wd2, hp, 1).astype(jnp.bfloat16)
    bd2_p = bd2.astype(jnp.float32)                   # [1, 1]

    return (emb_p, win_s, wf1_s, bf1_s, wf2_s, bf2_s,
            wo1_s, bo1_s, wo2_s, bo2_s, wd1_p, bd1_p, wd2_p, bd2_p)


# ----------------------------------------------------------------------------
# Forward pass
# ----------------------------------------------------------------------------
def schnet_atomic_forward(z, coord, edge_index, n_nodes, atom_mask, edge_mask,
                          packed_params, *, cutoff, n_rbf, max_edge_tile=1024):
    (emb_p, win_s, wf1_s, bf1_s, wf2_s, bf2_s,
     wo1_s, bo1_s, wo2_s, bo2_s, wd1_p, bd1_p, wd2_p, bd2_p) = packed_params
    n_layers, fp = win_s.shape[0], win_s.shape[2]
    rp = wf1_s.shape[1]
    hp = wd1_p.shape[1]

    n_real = z.shape[0]
    n_pad = _round_up(n_real, 8)
    row, col = edge_index[0], edge_index[1]
    n_edges = row.shape[0]
    if n_edges <= max_edge_tile:
        t_e = _round_up(n_edges, 8)               # single edge tile
        e_pad = t_e
    else:
        t_e = max_edge_tile                       # multiple of 128
        e_pad = _round_up(n_edges, t_e)

    # ---- tiny elementwise prep shared by all layers (plain JAX) -------------
    coord_diff = coord[row] - coord[col]
    radial = jnp.sqrt(jnp.sum(coord_diff * coord_diff, axis=1))          # [E]

    h0 = jnp.pad(emb_p[z], ((0, n_pad - n_real), (0, 0))).astype(jnp.float32)
    rbf = gaussian_rbf(radial, cutoff, n_rbf) * edge_mask                # [E, R]
    cut = cosine_cutoff(radial, cutoff) * edge_mask                      # [E, 1]
    # padded / masked edges get rbf=0, cut=0 -> Wij=0 -> zero contribution
    rbf = jnp.pad(rbf, ((0, e_pad - n_edges), (0, rp - n_rbf))).astype(jnp.bfloat16)
    cut = jnp.pad(cut, ((0, e_pad - n_edges), (0, 0))).astype(jnp.float32)
    amask = jnp.pad(atom_mask.astype(jnp.float32), ((0, n_pad - n_real), (0, 0)))
    # edge indices streamed as VMEM tiles (padded edges point at node 0 but
    # carry Wij=0, so they contribute nothing)
    idx_i = jnp.pad(row, (0, e_pad - n_edges)).astype(jnp.int32).reshape(1, e_pad)
    idx_j = jnp.pad(col, (0, e_pad - n_edges)).astype(jnp.int32).reshape(e_pad, 1)

    node_full = lambda l, e: (0, 0)              # resident across the whole grid
    edge_tile = lambda l, e: (e, 0)              # streamed per edge tile
    per_layer = lambda l, e: (l, 0, 0)           # re-fetched once per layer

    grid_spec = pltpu.PrefetchScalarGridSpec(
        num_scalar_prefetch=0,
        grid=(n_layers, e_pad // t_e),
        in_specs=[
            pl.BlockSpec((1, t_e), lambda l, e: (0, e)),  # idx_i (row layout)
            pl.BlockSpec((t_e, 1), edge_tile),            # idx_j (col layout)
            pl.BlockSpec((n_pad, fp), node_full),         # h0
            pl.BlockSpec((t_e, rp), edge_tile),           # rbf (lane-dense K)
            pl.BlockSpec((t_e, 1), edge_tile),            # dist_cut
            pl.BlockSpec((n_pad, 1), node_full),          # atom_mask
            pl.BlockSpec((None, fp, fp), per_layer),      # in2f W
            pl.BlockSpec((None, rp, fp), per_layer),      # filter W1
            pl.BlockSpec((None, 1, fp), per_layer),       # filter b1
            pl.BlockSpec((None, fp, fp), per_layer),      # filter W2
            pl.BlockSpec((None, 1, fp), per_layer),       # filter b2
            pl.BlockSpec((None, fp, fp), per_layer),      # f2out W1
            pl.BlockSpec((None, 1, fp), per_layer),       # f2out b1
            pl.BlockSpec((None, fp, fp), per_layer),      # f2out W2
            pl.BlockSpec((None, 1, fp), per_layer),       # f2out b2
            pl.BlockSpec((fp, hp), node_full),            # decoder W1
            pl.BlockSpec((1, hp), node_full),             # decoder b1
            pl.BlockSpec((hp, 1), node_full),             # decoder W2
            pl.BlockSpec((1, 1), node_full),              # decoder b2
        ],
        out_specs=pl.BlockSpec((n_pad, 1), node_full),
        scratch_shapes=[
            pltpu.VMEM((n_pad, fp), jnp.float32),         # h carry across layers
            pltpu.VMEM((n_pad, fp), jnp.bfloat16),        # x = in2f(h) (MXU operand)
            pltpu.VMEM((n_pad, fp), jnp.float32),         # segment-sum accumulator
        ],
    )

    ac_pad = pl.pallas_call(
        schnet_fused_kernel,
        out_shape=jax.ShapeDtypeStruct((n_pad, 1), jnp.float32),
        grid_spec=grid_spec,
        compiler_params=pltpu.CompilerParams(
            # both grid axes carry sequential state (layer carry, edge reduction)
            dimension_semantics=("arbitrary", "arbitrary"),
            # raises v5e's 16 MiB scoped default; stays inside v7x's 64 MiB
            vmem_limit_bytes=32 * 1024 * 1024,
        ),
    )(idx_i, idx_j, h0, rbf, cut, amask,
      win_s, wf1_s, bf1_s, wf2_s, bf2_s, wo1_s, bo1_s, wo2_s, bo2_s,
      wd1_p, bd1_p, wd2_p, bd2_p)

    # per-molecule readout: molecules are contiguous blocks of n_nodes atoms
    ac = ac_pad[:n_real, 0].reshape(-1, n_nodes)        # [B, n_nodes]
    pred = jnp.sum(ac, axis=1)                          # [B]
    return pred, ac


# ----------------------------------------------------------------------------
if __name__ == "__main__":
    key = jax.random.PRNGKey(0)

    # small synthetic problem
    n_hf, n_rbf, cutoff, n_interactions, max_z = 32, 16, 5.0, 2, 10
    n_mols, n_nodes = 2, 4
    n_total = n_mols * n_nodes

    k_z, k_c, k_p = jax.random.split(key, 3)
    z = jax.random.randint(k_z, (n_total,), 1, max_z, dtype=jnp.int32)
    coord = 2.0 * jax.random.normal(k_c, (n_total, 3), jnp.float32)

    # fully connected edges (no self loops) within each molecule
    edges = []
    for b in range(n_mols):
        for i in range(n_nodes):
            for j in range(n_nodes):
                if i != j:
                    edges.append((b * n_nodes + i, b * n_nodes + j))
    edge_index = jnp.asarray(edges, dtype=jnp.int32).T                   # [2, E]
    n_edges = edge_index.shape[1]

    atom_mask = jnp.ones((n_total, 1), jnp.float32).at[n_total - 1, 0].set(0.0)
    edge_mask = jnp.ones((n_edges, 1), jnp.float32).at[n_edges - 1, 0].set(0.0)

    raw_params = init_params(k_p, n_hf, n_rbf, n_interactions, max_z)
    packed = pack_params(raw_params, n_hf, n_rbf)

    pred, ac = schnet_atomic_forward(
        z, coord, edge_index, n_nodes, atom_mask, edge_mask, packed,
        cutoff=cutoff, n_rbf=n_rbf)

    jax.block_until_ready(pred)
    jax.block_until_ready(ac)
    assert pred.shape == (n_mols,) and ac.shape == (n_mols, n_nodes)
    assert bool(jnp.all(jnp.isfinite(pred))) and bool(jnp.all(jnp.isfinite(ac)))
    print("KERNEL_OK")
</pallas_src>

<mosaic_0001>
module attributes {stable_mosaic.version = 11 : i64} {
  func.func @schnet_fused_kernel(%arg0: i32, %arg1: i32, %arg2: memref<1x24xi32, #tpu.memory_space<vmem>>, %arg3: memref<24x1xi32, #tpu.memory_space<vmem>>, %arg4: memref<8x128xf32, #tpu.memory_space<vmem>>, %arg5: memref<24x128xbf16, #tpu.memory_space<vmem>>, %arg6: memref<24x1xf32, #tpu.memory_space<vmem>>, %arg7: memref<8x1xf32, #tpu.memory_space<vmem>>, %arg8: memref<1x128x128xbf16, #tpu.memory_space<vmem>>, %arg9: memref<1x128x128xbf16, #tpu.memory_space<vmem>>, %arg10: memref<1x1x128xf32, #tpu.memory_space<vmem>>, %arg11: memref<1x128x128xbf16, #tpu.memory_space<vmem>>, %arg12: memref<1x1x128xf32, #tpu.memory_space<vmem>>, %arg13: memref<1x128x128xbf16, #tpu.memory_space<vmem>>, %arg14: memref<1x1x128xf32, #tpu.memory_space<vmem>>, %arg15: memref<1x128x128xbf16, #tpu.memory_space<vmem>>, %arg16: memref<1x1x128xf32, #tpu.memory_space<vmem>>, %arg17: memref<128x128xbf16, #tpu.memory_space<vmem>>, %arg18: memref<1x128xf32, #tpu.memory_space<vmem>>, %arg19: memref<128x1xbf16, #tpu.memory_space<vmem>>, %arg20: memref<1x1xf32, #tpu.memory_space<vmem>>, %arg21: memref<8x1xf32, #tpu.memory_space<vmem>>, %arg22: memref<8x128xf32, #tpu.memory_space<vmem>>, %arg23: memref<8x128xbf16, #tpu.memory_space<vmem>>, %arg24: memref<8x128xf32, #tpu.memory_space<vmem>>) attributes {dimension_semantics = [#tpu.dimension_semantics<arbitrary>, #tpu.dimension_semantics<arbitrary>], iteration_bounds = array<i64: 2, 1>, scalar_prefetch = 0 : i64, scratch_operands = 3 : i64, tpu.core_type = #tpu.core_type<tc>, window_params = [{transform_indices = @transform_0, window_bounds = array<i64: 1, 24>}, {transform_indices = @transform_1, window_bounds = array<i64: 24, 1>}, {pipeline_mode = #tpu.pipeline_mode<synchronous>, transform_indices = @transform_2, window_bounds = array<i64: 8, 128>}, {transform_indices = @transform_3, window_bounds = array<i64: 24, 128>}, {transform_indices = @transform_4, window_bounds = array<i64: 24, 1>}, {pipeline_mode = #tpu.pipeline_mode<synchronous>, transform_indices = @transform_5, window_bounds = array<i64: 8, 1>}, {transform_indices = @transform_6, window_bounds = array<i64: 1, 128, 128>}, {transform_indices = @transform_7, window_bounds = array<i64: 1, 128, 128>}, {transform_indices = @transform_8, window_bounds = array<i64: 1, 1, 128>}, {transform_indices = @transform_9, window_bounds = array<i64: 1, 128, 128>}, {transform_indices = @transform_10, window_bounds = array<i64: 1, 1, 128>}, {transform_indices = @transform_11, window_bounds = array<i64: 1, 128, 128>}, {transform_indices = @transform_12, window_bounds = array<i64: 1, 1, 128>}, {transform_indices = @transform_13, window_bounds = array<i64: 1, 128, 128>}, {transform_indices = @transform_14, window_bounds = array<i64: 1, 1, 128>}, {pipeline_mode = #tpu.pipeline_mode<synchronous>, transform_indices = @transform_15, window_bounds = array<i64: 128, 128>}, {pipeline_mode = #tpu.pipeline_mode<synchronous>, transform_indices = @transform_16, window_bounds = array<i64: 1, 128>}, {pipeline_mode = #tpu.pipeline_mode<synchronous>, transform_indices = @transform_17, window_bounds = array<i64: 128, 1>}, {pipeline_mode = #tpu.pipeline_mode<synchronous>, transform_indices = @transform_18, window_bounds = array<i64: 1, 1>}, {pipeline_mode = #tpu.pipeline_mode<synchronous>, transform_indices = @transform_19, window_bounds = array<i64: 8, 1>}]} {
    %c0_i32 = arith.constant 0 : i32
    %0 = arith.cmpi eq, %arg1, %c0_i32 : i32
    %1 = arith.extui %0 : i1 to i32
    %c0_i32_0 = arith.constant 0 : i32
    %2 = arith.cmpi ne, %1, %c0_i32_0 : i32
    scf.if %2 {
      %c0_i32_35 = arith.constant 0 : i32
      %59 = arith.cmpi eq, %arg0, %c0_i32_35 : i32
      %60 = arith.extui %59 : i1 to i32
      %c0_i32_36 = arith.constant 0 : i32
      %61 = arith.cmpi ne, %60, %c0_i32_36 : i32
      scf.if %61 {
        %c0_48 = arith.constant 0 : index
        %c0_49 = arith.constant 0 : index
        %71 = vector.load %arg4[%c0_48, %c0_49] : memref<8x128xf32, #tpu.memory_space<vmem>>, vector<8x128xf32>
        %c0_50 = arith.constant 0 : index
        %c0_51 = arith.constant 0 : index
        %72 = vector.load %arg22[%c0_50, %c0_51] : memref<8x128xf32, #tpu.memory_space<vmem>>, vector<8x128xf32>
        tpu.vector_store %arg22[%c0_50, %c0_51], %71 {strides = array<i32>} : memref<8x128xf32, #tpu.memory_space<vmem>>, vector<8x128xf32>,
      } else {
      }
      %c0_37 = arith.constant 0 : index
      %c0_38 = arith.constant 0 : index
      %62 = vector.load %arg22[%c0_37, %c0_38] : memref<8x128xf32, #tpu.memory_space<vmem>>, vector<8x128xf32>
      %63 = arith.truncf %62 : vector<8x128xf32> to vector<8x128xbf16>
      %c0_39 = arith.constant 0 : index
      %c0_40 = arith.constant 0 : index
      %c0_41 = arith.constant 0 : index
      %64 = vector.load %arg8[%c0_39, %c0_40, %c0_41] : memref<1x128x128xbf16, #tpu.memory_space<vmem>>, vector<1x128x128xbf16>
      %65 = vector.shape_cast %64 : vector<1x128x128xbf16> to vector<128x128xbf16>
      %cst_42 = arith.constant dense<0.000000e+00> : vector<8x128xf32>
      %66 = tpu.matmul %63, %65, %cst_42 {dimension_numbers = #tpu.dot_dimension_numbers<[1], [0], [0], [1], [0, 0, 1, 1], [], []>} : vector<8x128xbf16>, vector<128x128xbf16>, vector<8x128xf32> -> vector<8x128xf32>
      %67 = arith.truncf %66 : vector<8x128xf32> to vector<8x128xbf16>
      %c0_43 = arith.constant 0 : index
      %c0_44 = arith.constant 0 : index
      %68 = vector.load %arg23[%c0_43, %c0_44] : memref<8x128xbf16, #tpu.memory_space<vmem>>, vector<8x128xbf16>
      tpu.vector_store %arg23[%c0_43, %c0_44], %67 {strides = array<i32>} : memref<8x128xbf16, #tpu.memory_space<vmem>>, vector<8x128xbf16>,
      %cst_45 = arith.constant 0.000000e+00 : f32
      %69 = vector.broadcast %cst_45 : f32 to vector<8x128xf32>
      %c0_46 = arith.constant 0 : index
      %c0_47 = arith.constant 0 : index
      %70 = vector.load %arg24[%c0_46, %c0_47] : memref<8x128xf32, #tpu.memory_space<vmem>>, vector<8x128xf32>
      tpu.vector_store %arg24[%c0_46, %c0_47], %69 {strides = array<i32>} : memref<8x128xf32, #tpu.memory_space<vmem>>, vector<8x128xf32>,
    } else {
    }
    %c0 = arith.constant 0 : index
    %c0_1 = arith.constant 0 : index
    %3 = vector.load %arg5[%c0, %c0_1] : memref<24x128xbf16, #tpu.memory_space<vmem>>, vector<24x128xbf16>
    %c0_2 = arith.constant 0 : index
    %c0_3 = arith.constant 0 : index
    %c0_4 = arith.constant 0 : index
    %4 = vector.load %arg9[%c0_2, %c0_3, %c0_4] : memref<1x128x128xbf16, #tpu.memory_space<vmem>>, vector<1x128x128xbf16>
    %5 = vector.shape_cast %4 : vector<1x128x128xbf16> to vector<128x128xbf16>
    %cst = arith.constant dense<0.000000e+00> : vector<24x128xf32>
    %6 = tpu.matmul %3, %5, %cst {dimension_numbers = #tpu.dot_dimension_numbers<[1], [0], [0], [1], [0, 0, 1, 1], [], []>} : vector<24x128xbf16>, vector<128x128xbf16>, vector<24x128xf32> -> vector<24x128xf32>
    %c0_5 = arith.constant 0 : index
    %c0_6 = arith.constant 0 : index
    %c0_7 = arith.constant 0 : index
    %7 = vector.load %arg10[%c0_5, %c0_6, %c0_7] : memref<1x1x128xf32, #tpu.memory_space<vmem>>, vector<1x1x128xf32>
    %8 = vector.shape_cast %7 : vector<1x1x128xf32> to vector<1x128xf32>
    %9 = vector.broadcast %8 : vector<1x128xf32> to vector<24x128xf32>
    %10 = arith.addf %6, %9 : vector<24x128xf32>
    %cst_8 = arith.constant 0.000000e+00 : f32
    %11 = vector.broadcast %cst_8 : f32 to vector<24x128xf32>
    %12 = arith.maximumf %10, %11 : vector<24x128xf32>
    %13 = math.absf %10 : vector<24x128xf32>
    %cst_9 = arith.constant 0.000000e+00 : f32
    %14 = vector.broadcast %cst_9 : f32 to vector<24x128xf32>
    %15 = arith.subf %14, %13 : vector<24x128xf32>
    %16 = math.exp %15 : vector<24x128xf32>
    %cst_10 = arith.constant 1.000000e+00 : f32
    %17 = vector.broadcast %cst_10 : f32 to vector<24x128xf32>
    %18 = arith.addf %17, %16 : vector<24x128xf32>
    %19 = math.log %18 : vector<24x128xf32>
    %20 = arith.addf %12, %19 : vector<24x128xf32>
    %cst_11 = arith.constant 0.693147182 : f32
    %21 = vector.broadcast %cst_11 : f32 to vector<24x128xf32>
    %22 = arith.subf %20, %21 : vector<24x128xf32>
    %23 = arith.truncf %22 : vector<24x128xf32> to vector<24x128xbf16>
    %c0_12 = arith.constant 0 : index
    %c0_13 = arith.constant 0 : index
    %c0_14 = arith.constant 0 : index
    %24 = vector.load %arg11[%c0_12, %c0_13, %c0_14] : memref<1x128x128xbf16, #tpu.memory_space<vmem>>, vector<1x128x128xbf16>
    %25 = vector.shape_cast %24 : vector<1x128x128xbf16> to vector<128x128xbf16>
    %cst_15 = arith.constant dense<0.000000e+00> : vector<24x128xf32>
    %26 = tpu.matmul %23, %25, %cst_15 {dimension_numbers = #tpu.dot_dimension_numbers<[1], [0], [0], [1], [0, 0, 1, 1], [], []>} : vector<24x128xbf16>, vector<128x128xbf16>, vector<24x128xf32> -> vector<24x128xf32>
    %c0_16 = arith.constant 0 : index
    %c0_17 = arith.constant 0 : index
    %c0_18 = arith.constant 0 : index
    %27 = vector.load %arg12[%c0_16, %c0_17, %c0_18] : memref<1x1x128xf32, #tpu.memory_space<vmem>>, vector<1x1x128xf32>
    %28 = vector.shape_cast %27 : vector<1x1x128xf32> to vector<1x128xf32>
    %29 = vector.broadcast %28 : vector<1x128xf32> to vector<24x128xf32>
    %30 = arith.addf %26, %29 : vector<24x128xf32>
    %c0_19 = arith.constant 0 : index
    %c0_20 = arith.constant 0 : index
    %31 = vector.load %arg6[%c0_19, %c0_20] : memref<24x1xf32, #tpu.memory_space<vmem>>, vector<24x1xf32>
    %32 = vector.broadcast %31 : vector<24x1xf32> to vector<24x128xf32>
    %33 = arith.mulf %30, %32 : vector<24x128xf32>
    %34 = tpu.iota {dimensions = array<i32: 1>} : vector<24x8xi32>
    %c0_21 = arith.constant 0 : index
    %c0_22 = arith.constant 0 : index
    %35 = vector.load %arg3[%c0_21, %c0_22] : memref<24x1xi32, #tpu.memory_space<vmem>>, vector<24x1xi32>
    %36 = vector.broadcast %35 : vector<24x1xi32> to vector<24x8xi32>
    %37 = arith.cmpi eq, %34, %36 : vector<24x8xi32>
    %38 = arith.extui %37 : vector<24x8xi1> to vector<24x8xi32>
    %39 = arith.sitofp %38 : vector<24x8xi32> to vector<24x8xf32>
    %40 = arith.truncf %39 : vector<24x8xf32> to vector<24x8xbf16>
    %c0_23 = arith.constant 0 : index
    %c0_24 = arith.constant 0 : index
    %41 = vector.load %arg23[%c0_23, %c0_24] : memref<8x128xbf16, #tpu.memory_space<vmem>>, vector<8x128xbf16>
    %cst_25 = arith.constant dense<0.000000e+00> : vector<24x128xf32>
    %42 = tpu.matmul %40, %41, %cst_25 {dimension_numbers = #tpu.dot_dimension_numbers<[1], [0], [0], [1], [0, 0, 1, 1], [], []>} : vector<24x8xbf16>, vector<8x128xbf16>, vector<24x128xf32> -> vector<24x128xf32>
    %43 = arith.mulf %42, %33 : vector<24x128xf32>
    %44 = tpu.iota {dimensions = array<i32: 0>} : vector<8x24xi32>
    %c0_26 = arith.constant 0 : index
    %c0_27 = arith.constant 0 : index
    %45 = vector.load %arg2[%c0_26, %c0_27] : memref<1x24xi32, #tpu.memory_space<vmem>>, vector<1x24xi32>
    %46 = vector.broadcast %45 : vector<1x24xi32> to vector<8x24xi32>
    %47 = arith.cmpi eq, %44, %46 : vector<8x24xi32>
    %48 = arith.extui %47 : vector<8x24xi1> to vector<8x24xi32>
    %49 = arith.sitofp %48 : vector<8x24xi32> to vector<8x24xf32>
    %50 = arith.truncf %49 : vector<8x24xf32> to vector<8x24xbf16>
    %c0_28 = arith.constant 0 : index
    %c0_29 = arith.constant 0 : index
    %51 = vector.load %arg24[%c0_28, %c0_29] : memref<8x128xf32, #tpu.memory_space<vmem>>, vector<8x128xf32>
    %52 = arith.truncf %43 : vector<24x128xf32> to vector<24x128xbf16>
    %cst_30 = arith.constant dense<0.000000e+00> : vector<8x128xf32>
    %53 = tpu.matmul %50, %52, %cst_30 {dimension_numbers = #tpu.dot_dimension_numbers<[1], [0], [0], [1], [0, 0, 1, 1], [], []>} : vector<8x24xbf16>, vector<24x128xbf16>, vector<8x128xf32> -> vector<8x128xf32>
    %54 = arith.addf %51, %53 : vector<8x128xf32>
    %c0_31 = arith.constant 0 : index
    %c0_32 = arith.constant 0 : index
    %55 = vector.load %arg24[%c0_31, %c0_32] : memref<8x128xf32, #tpu.memory_space<vmem>>, vector<8x128xf32>
    tpu.vector_store %arg24[%c0_31, %c0_32], %54 {strides = array<i32>} : memref<8x128xf32, #tpu.memory_space<vmem>>, vector<8x128xf32>,
    %c0_i32_33 = arith.constant 0 : i32
    %56 = arith.cmpi eq, %arg1, %c0_i32_33 : i32
    %57 = arith.extui %56 : i1 to i32
    %c0_i32_34 = arith.constant 0 : i32
    %58 = arith.cmpi ne, %57, %c0_i32_34 : i32
    scf.if %58 {
      %c0_35 = arith.constant 0 : index
      %c0_36 = arith.constant 0 : index
      %59 = vector.load %arg24[%c0_35, %c0_36] : memref<8x128xf32, #tpu.memory_space<vmem>>, vector<8x128xf32>
      %60 = arith.truncf %59 : vector<8x128xf32> to vector<8x128xbf16>
      %c0_37 = arith.constant 0 : index
      %c0_38 = arith.constant 0 : index
      %c0_39 = arith.constant 0 : index
      %61 = vector.load %arg13[%c0_37, %c0_38, %c0_39] : memref<1x128x128xbf16, #tpu.memory_space<vmem>>, vector<1x128x128xbf16>
      %62 = vector.shape_cast %61 : vector<1x128x128xbf16> to vector<128x128xbf16>
      %cst_40 = arith.constant dense<0.000000e+00> : vector<8x128xf32>
      %63 = tpu.matmul %60, %62, %cst_40 {dimension_numbers = #tpu.dot_dimension_numbers<[1], [0], [0], [1], [0, 0, 1, 1], [], []>} : vector<8x128xbf16>, vector<128x128xbf16>, vector<8x128xf32> -> vector<8x128xf32>
      %c0_41 = arith.constant 0 : index
      %c0_42 = arith.constant 0 : index
      %c0_43 = arith.constant 0 : index
      %64 = vector.load %arg14[%c0_41, %c0_42, %c0_43] : memref<1x1x128xf32, #tpu.memory_space<vmem>>, vector<1x1x128xf32>
      %65 = vector.shape_cast %64 : vector<1x1x128xf32> to vector<1x128xf32>
      %66 = vector.broadcast %65 : vector<1x128xf32> to vector<8x128xf32>
      %67 = arith.addf %63, %66 : vector<8x128xf32>
      %cst_44 = arith.constant 0.000000e+00 : f32
      %68 = vector.broadcast %cst_44 : f32 to vector<8x128xf32>
      %69 = arith.maximumf %67, %68 : vector<8x128xf32>
      %70 = math.absf %67 : vector<8x128xf32>
      %cst_45 = arith.constant 0.000000e+00 : f32
      %71 = vector.broadcast %cst_45 : f32 to vector<8x128xf32>
      %72 = arith.subf %71, %70 : vector<8x128xf32>
      %73 = math.exp %72 : vector<8x128xf32>
      %cst_46 = arith.constant 1.000000e+00 : f32
      %74 = vector.broadcast %cst_46 : f32 to vector<8x128xf32>
      %75 = arith.addf %74, %73 : vector<8x128xf32>
      %76 = math.log %75 : vector<8x128xf32>
      %77 = arith.addf %69, %76 : vector<8x128xf32>
      %cst_47 = arith.constant 0.693147182 : f32
      %78 = vector.broadcast %cst_47 : f32 to vector<8x128xf32>
      %79 = arith.subf %77, %78 : vector<8x128xf32>
      %80 = arith.truncf %79 : vector<8x128xf32> to vector<8x128xbf16>
      %c0_48 = arith.constant 0 : index
      %c0_49 = arith.constant 0 : index
      %c0_50 = arith.constant 0 : index
      %81 = vector.load %arg15[%c0_48, %c0_49, %c0_50] : memref<1x128x128xbf16, #tpu.memory_space<vmem>>, vector<1x128x128xbf16>
      %82 = vector.shape_cast %81 : vector<1x128x128xbf16> to vector<128x128xbf16>
      %cst_51 = arith.constant dense<0.000000e+00> : vector<8x128xf32>
      %83 = tpu.matmul %80, %82, %cst_51 {dimension_numbers = #tpu.dot_dimension_numbers<[1], [0], [0], [1], [0, 0, 1, 1], [], []>} : vector<8x128xbf16>, vector<128x128xbf16>, vector<8x128xf32> -> vector<8x128xf32>
      %c0_52 = arith.constant 0 : index
      %c0_53 = arith.constant 0 : index
      %c0_54 = arith.constant 0 : index
      %84 = vector.load %arg16[%c0_52, %c0_53, %c0_54] : memref<1x1x128xf32, #tpu.memory_space<vmem>>, vector<1x1x128xf32>
      %85 = vector.shape_cast %84 : vector<1x1x128xf32> to vector<1x128xf32>
      %86 = vector.broadcast %85 : vector<1x128xf32> to vector<8x128xf32>
      %87 = arith.addf %83, %86 : vector<8x128xf32>
      %c0_55 = arith.constant 0 : index
      %c0_56 = arith.constant 0 : index
      %88 = vector.load %arg22[%c0_55, %c0_56] : memref<8x128xf32, #tpu.memory_space<vmem>>, vector<8x128xf32>
      %89 = arith.addf %88, %87 : vector<8x128xf32>
      %c0_57 = arith.constant 0 : index
      %c0_58 = arith.constant 0 : index
      %90 = vector.load %arg22[%c0_57, %c0_58] : memref<8x128xf32, #tpu.memory_space<vmem>>, vector<8x128xf32>
      tpu.vector_store %arg22[%c0_57, %c0_58], %89 {strides = array<i32>} : memref<8x128xf32, #tpu.memory_space<vmem>>, vector<8x128xf32>,
      %c1_i32 = arith.constant 1 : i32
      %91 = arith.cmpi eq, %arg0, %c1_i32 : i32
      %92 = arith.extui %91 : i1 to i32
      %c0_i32_59 = arith.constant 0 : i32
      %93 = arith.cmpi ne, %92, %c0_i32_59 : i32
      scf.if %93 {
        %c0_60 = arith.constant 0 : index
        %c0_61 = arith.constant 0 : index
        %94 = vector.load %arg22[%c0_60, %c0_61] : memref<8x128xf32, #tpu.memory_space<vmem>>, vector<8x128xf32>
        %c0_62 = arith.constant 0 : index
        %c0_63 = arith.constant 0 : index
        %95 = vector.load %arg7[%c0_62, %c0_63] : memref<8x1xf32, #tpu.memory_space<vmem>>, vector<8x1xf32>
        %96 = vector.broadcast %95 : vector<8x1xf32> to vector<8x128xf32>
        %97 = arith.mulf %94, %96 : vector<8x128xf32>
        %98 = arith.truncf %97 : vector<8x128xf32> to vector<8x128xbf16>
        %c0_64 = arith.constant 0 : index
        %c0_65 = arith.constant 0 : index
        %99 = vector.load %arg17[%c0_64, %c0_65] : memref<128x128xbf16, #tpu.memory_space<vmem>>, vector<128x128xbf16>
        %cst_66 = arith.constant dense<0.000000e+00> : vector<8x128xf32>
        %100 = tpu.matmul %98, %99, %cst_66 {dimension_numbers = #tpu.dot_dimension_numbers<[1], [0], [0], [1], [0, 0, 1, 1], [], []>} : vector<8x128xbf16>, vector<128x128xbf16>, vector<8x128xf32> -> vector<8x128xf32>
        %c0_67 = arith.constant 0 : index
        %c0_68 = arith.constant 0 : index
        %101 = vector.load %arg18[%c0_67, %c0_68] : memref<1x128xf32, #tpu.memory_space<vmem>>, vector<1x128xf32>
        %102 = vector.broadcast %101 : vector<1x128xf32> to vector<8x128xf32>
        %103 = arith.addf %100, %102 : vector<8x128xf32>
        %cst_69 = arith.constant 0.000000e+00 : f32
        %104 = vector.broadcast %cst_69 : f32 to vector<8x128xf32>
        %105 = arith.maximumf %103, %104 : vector<8x128xf32>
        %106 = math.absf %103 : vector<8x128xf32>
        %cst_70 = arith.constant 0.000000e+00 : f32
        %107 = vector.broadcast %cst_70 : f32 to vector<8x128xf32>
        %108 = arith.subf %107, %106 : vector<8x128xf32>
        %109 = math.exp %108 : vector<8x128xf32>
        %cst_71 = arith.constant 1.000000e+00 : f32
        %110 = vector.broadcast %cst_71 : f32 to vector<8x128xf32>
        %111 = arith.addf %110, %109 : vector<8x128xf32>
        %112 = math.log %111 : vector<8x128xf32>
        %113 = arith.addf %105, %112 : vector<8x128xf32>
        %cst_72 = arith.constant 0.693147182 : f32
        %114 = vector.broadcast %cst_72 : f32 to vector<8x128xf32>
        %115 = arith.subf %113, %114 : vector<8x128xf32>
        %116 = arith.truncf %115 : vector<8x128xf32> to vector<8x128xbf16>
        %c0_73 = arith.constant 0 : index
        %c0_74 = arith.constant 0 : index
        %117 = vector.load %arg19[%c0_73, %c0_74] : memref<128x1xbf16, #tpu.memory_space<vmem>>, vector<128x1xbf16>
        %cst_75 = arith.constant dense<0.000000e+00> : vector<8x1xf32>
        %118 = tpu.matmul %116, %117, %cst_75 {dimension_numbers = #tpu.dot_dimension_numbers<[1], [0], [0], [1], [0, 0, 1, 1], [], []>} : vector<8x128xbf16>, vector<128x1xbf16>, vector<8x1xf32> -> vector<8x1xf32>
        %c0_76 = arith.constant 0 : index
        %c0_77 = arith.constant 0 : index
        %119 = vector.load %arg20[%c0_76, %c0_77] : memref<1x1xf32, #tpu.memory_space<vmem>>, vector<1x1xf32>
        %120 = vector.broadcast %119 : vector<1x1xf32> to vector<8x1xf32>
        %121 = arith.addf %118, %120 : vector<8x1xf32>
        %c0_78 = arith.constant 0 : index
        %c0_79 = arith.constant 0 : index
        %122 = vector.load %arg7[%c0_78, %c0_79] : memref<8x1xf32, #tpu.memory_space<vmem>>, vector<8x1xf32>
        %123 = arith.mulf %121, %122 : vector<8x1xf32>
        %c0_80 = arith.constant 0 : index
        %c0_81 = arith.constant 0 : index
        %124 = vector.load %arg21[%c0_80, %c0_81] : memref<8x1xf32, #tpu.memory_space<vmem>>, vector<8x1xf32>
        tpu.vector_store %arg21[%c0_80, %c0_81], %123 {strides = array<i32>} : memref<8x1xf32, #tpu.memory_space<vmem>>, vector<8x1xf32>,
      } else {
      }
    } else {
    }
    return
  }
  func.func @transform_0(%arg0: i32, %arg1: i32) -> (i32, i32) {
    %c0_i32 = arith.constant 0 : i32
    %c0_i32_0 = arith.constant 0 : i32
    return %c0_i32, %arg1 : i32, i32
  }
  func.func @transform_1(%arg0: i32, %arg1: i32) -> (i32, i32) {
    %c0_i32 = arith.constant 0 : i32
    %c0_i32_0 = arith.constant 0 : i32
    return %arg1, %c0_i32 : i32, i32
  }
  func.func @transform_2(%arg0: i32, %arg1: i32) -> (i32, i32) {
    %c0_i32 = arith.constant 0 : i32
    %c0_i32_0 = arith.constant 0 : i32
    %c0_i32_1 = arith.constant 0 : i32
    return %c0_i32, %c0_i32_0 : i32, i32
  }
  func.func @transform_3(%arg0: i32, %arg1: i32) -> (i32, i32) {
    %c0_i32 = arith.constant 0 : i32
    %c0_i32_0 = arith.constant 0 : i32
    return %arg1, %c0_i32 : i32, i32
  }
  func.func @transform_4(%arg0: i32, %arg1: i32) -> (i32, i32) {
    %c0_i32 = arith.constant 0 : i32
    %c0_i32_0 = arith.constant 0 : i32
    return %arg1, %c0_i32 : i32, i32
  }
  func.func @transform_5(%arg0: i32, %arg1: i32) -> (i32, i32) {
    %c0_i32 = arith.constant 0 : i32
    %c0_i32_0 = arith.constant 0 : i32
    %c0_i32_1 = arith.constant 0 : i32
    return %c0_i32, %c0_i32_0 : i32, i32
  }
  func.func @transform_6(%arg0: i32, %arg1: i32) -> (i32, i32, i32) {
    %c0_i32 = arith.constant 0 : i32
    %c0_i32_0 = arith.constant 0 : i32
    %c0_i32_1 = arith.constant 0 : i32
    return %arg0, %c0_i32, %c0_i32_0 : i32, i32, i32
  }
  func.func @transform_7(%arg0: i32, %arg1: i32) -> (i32, i32, i32) {
    %c0_i32 = arith.constant 0 : i32
    %c0_i32_0 = arith.constant 0 : i32
    %c0_i32_1 = arith.constant 0 : i32
    return %arg0, %c0_i32, %c0_i32_0 : i32, i32, i32
  }
  func.func @transform_8(%arg0: i32, %arg1: i32) -> (i32, i32, i32) {
    %c0_i32 = arith.constant 0 : i32
    %c0_i32_0 = arith.constant 0 : i32
    %c0_i32_1 = arith.constant 0 : i32
    return %arg0, %c0_i32, %c0_i32_0 : i32, i32, i32
  }
  func.func @transform_9(%arg0: i32, %arg1: i32) -> (i32, i32, i32) {
    %c0_i32 = arith.constant 0 : i32
    %c0_i32_0 = arith.constant 0 : i32
    %c0_i32_1 = arith.constant 0 : i32
    return %arg0, %c0_i32, %c0_i32_0 : i32, i32, i32
  }
  func.func @transform_10(%arg0: i32, %arg1: i32) -> (i32, i32, i32) {
    %c0_i32 = arith.constant 0 : i32
    %c0_i32_0 = arith.constant 0 : i32
    %c0_i32_1 = arith.constant 0 : i32
    return %arg0, %c0_i32, %c0_i32_0 : i32, i32, i32
  }
  func.func @transform_11(%arg0: i32, %arg1: i32) -> (i32, i32, i32) {
    %c0_i32 = arith.constant 0 : i32
    %c0_i32_0 = arith.constant 0 : i32
    %c0_i32_1 = arith.constant 0 : i32
    return %arg0, %c0_i32, %c0_i32_0 : i32, i32, i32
  }
  func.func @transform_12(%arg0: i32, %arg1: i32) -> (i32, i32, i32) {
    %c0_i32 = arith.constant 0 : i32
    %c0_i32_0 = arith.constant 0 : i32
    %c0_i32_1 = arith.constant 0 : i32
    return %arg0, %c0_i32, %c0_i32_0 : i32, i32, i32
  }
  func.func @transform_13(%arg0: i32, %arg1: i32) -> (i32, i32, i32) {
    %c0_i32 = arith.constant 0 : i32
    %c0_i32_0 = arith.constant 0 : i32
    %c0_i32_1 = arith.constant 0 : i32
    return %arg0, %c0_i32, %c0_i32_0 : i32, i32, i32
  }
  func.func @transform_14(%arg0: i32, %arg1: i32) -> (i32, i32, i32) {
    %c0_i32 = arith.constant 0 : i32
    %c0_i32_0 = arith.constant 0 : i32
    %c0_i32_1 = arith.constant 0 : i32
    return %arg0, %c0_i32, %c0_i32_0 : i32, i32, i32
  }
  func.func @transform_15(%arg0: i32, %arg1: i32) -> (i32, i32) {
    %c0_i32 = arith.constant 0 : i32
    %c0_i32_0 = arith.constant 0 : i32
    %c0_i32_1 = arith.constant 0 : i32
    return %c0_i32, %c0_i32_0 : i32, i32
  }
  func.func @transform_16(%arg0: i32, %arg1: i32) -> (i32, i32) {
    %c0_i32 = arith.constant 0 : i32
    %c0_i32_0 = arith.constant 0 : i32
    %c0_i32_1 = arith.constant 0 : i32
    return %c0_i32, %c0_i32_0 : i32, i32
  }
  func.func @transform_17(%arg0: i32, %arg1: i32) -> (i32, i32) {
    %c0_i32 = arith.constant 0 : i32
    %c0_i32_0 = arith.constant 0 : i32
    %c0_i32_1 = arith.constant 0 : i32
    return %c0_i32, %c0_i32_0 : i32, i32
  }
  func.func @transform_18(%arg0: i32, %arg1: i32) -> (i32, i32) {
    %c0_i32 = arith.constant 0 : i32
    %c0_i32_0 = arith.constant 0 : i32
    %c0_i32_1 = arith.constant 0 : i32
    return %c0_i32, %c0_i32_0 : i32, i32
  }
  func.func @transform_19(%arg0: i32, %arg1: i32) -> (i32, i32) {
    %c0_i32 = arith.constant 0 : i32
    %c0_i32_0 = arith.constant 0 : i32
    %c0_i32_1 = arith.constant 0 : i32
    return %c0_i32, %c0_i32_0 : i32, i32
  }
}

</mosaic_0001>

<bundles_post_ra>
// kernel: tpu_custom_call.1
= control target key start
LH: loop header
LB: loop body
LE: loop exit
PB: predicated region body
PF: predicated region fallthrough
CT: control target
= control target key end

     0   :  { %s3624_s0 = inlined_call_operand.hbm [shape: s32[1,24], index: 0, kind: input, shape index: {}]   ;;  %s3625_s1 = inlined_call_operand.vmem [shape: s32[24,1], index: 1, kind: input, shape index: {}]   ;;  %s3626_s2 = inlined_call_operand.vmem [shape: f32[8,128], index: 2, kind: input, shape index: {}]   ;;  %s3627_s3 = inlined_call_operand.vmem [shape: bf16[24,128], index: 3, kind: input, shape index: {}]   ;;  %s3628_s4 = inlined_call_operand.vmem [shape: f32[24,1], index: 4, kind: input, shape index: {}]   ;;  %s3629_s5 = inlined_call_operand.vmem [shape: f32[8,1], index: 5, kind: input, shape index: {}]   ;;  %s3630_s6 = inlined_call_operand.vmem [shape: bf16[2,128,128], index: 6, kind: input, shape index: {}]   ;;  %s3631_s7 = inlined_call_operand.hbm [shape: bf16[2,128,128], index: 7, kind: input, shape index: {}]   ;;  %s3632_s8 = inlined_call_operand.vmem [shape: f32[2,1,128], index: 8, kind: input, shape index: {}]   ;;  %s3633_s9 = inlined_call_operand.hbm [shape: bf16[2,128,128], index: 9, kind: input, shape index: {}]   ;;  %s3634_s10 = inlined_call_operand.vmem [shape: f32[2,1,128], index: 10, kind: input, shape index: {}]   ;;  %s3635_s11 = inlined_call_operand.hbm [shape: bf16[2,128,128], index: 11, kind: input, shape index: {}]   ;;  %s3636_s12 = inlined_call_operand.vmem [shape: f32[2,1,128], index: 12, kind: input, shape index: {}]   ;;  %s3637_s13 = inlined_call_operand.hbm [shape: bf16[2,128,128], index: 13, kind: input, shape index: {}]   ;;  %s3638_s14 = inlined_call_operand.vmem [shape: f32[2,1,128], index: 14, kind: input, shape index: {}]   ;;  %s3639_s15 = inlined_call_operand.hbm [shape: bf16[128,128], index: 15, kind: input, shape index: {}]   ;;  %s3640_s16 = inlined_call_operand.vmem [shape: f32[1,128], index: 16, kind: input, shape index: {}]   ;;  %s3641_s17 = inlined_call_operand.vmem [shape: bf16[128,1], index: 17, kind: input, shape index: {}]   ;;  %s3642_s18 = inlined_call_operand.<no memory space> [shape: f32[1,1], index: 18, kind: input, shape index: {}]   ;;  %s3643_s19 = inlined_call_operand.vmem [shape: f32[8,1], index: 19, kind: output, shape index: {}]  }
   0x1   :  { %3665 = sst [smem:[#allocation24_spill]] %s3624_s0  ;;  %v24_v0 = vstv %s3642_s18 }
   0x2   :  { %3666 = sst [smem:[#allocation25_spill]] %s3625_s1  ;;  %25 = vst [vmem:[#allocation5] sm:$0x1] %v24_v0 }
   0x3   :  { %3667 = sst [smem:[#allocation26_spill]] %s3626_s2 }
   0x4   :  { %3668 = sst [smem:[#allocation27_spill]] %s3627_s3 }
   0x5   :  { %3669 = sst [smem:[#allocation28_spill]] %s3628_s4 }
   0x6   :  { %3670 = sst [smem:[#allocation29_spill]] %s3629_s5 }
   0x7   :  { %3671 = sst [smem:[#allocation30_spill]] %s3630_s6 }
   0x8   :  { %3672 = sst [smem:[#allocation31_spill]] %s3631_s7 }
   0x9   :  { %3673 = sst [smem:[#allocation32_spill]] %s3633_s9 }
   0xa   :  { %3674 = sst [smem:[#allocation33_spill]] %s3634_s10 }
   0xb   :  { %3675 = sst [smem:[#allocation34_spill]] %s3635_s11 }
   0xc   :  { %3676 = sst [smem:[#allocation35_spill]] %s3636_s12 }
   0xd   :  { %3677 = sst [smem:[#allocation36_spill]] %s3637_s13 }
   0xe   :  { %3678 = sst [smem:[#allocation37_spill]] %s3638_s14 }
   0xf   :  { %3679 = sst [smem:[#allocation38_spill]] %s3640_s16 }
  0x10   :  { %3680 = sst [smem:[#allocation39_spill]] %s3641_s17 }
  0x11   :  { %3681 = sst [smem:[#allocation40_spill]] %s3643_s19 }
  0x12   :  { %26 = vsyncpa [#allocation7], 0 }
  0x13   :  { %27 = vsyncpa [#allocation9], 0 }
  0x14   :  { %29 = vsyncpa [#allocation9 + $0x1], 0 }
  0x15   :  { %30 = vsyncpa [#allocation12], 0 }
  0x16   :  { %32 = vsyncpa [#allocation12 + $0x1], 0 }
  0x17   :  { %33 = vsyncpa [#allocation15], 0  ;;  %s3084_s20 = smov 0   ;;  %s3086_s21 = smov 0  }
  0x18   :  { %s3088_s1 = smov 0   ;;  %s3090_s22 = smov 0  }
  0x19   :  { %s3092_s2 = smov 0   ;;  %s3094_s23 = smov 0  }
  0x1a LB: > { %3682 = sst [smem:[#allocation20_spill]] %s2953_s1  ;;  %s51_s18 = sadd.s32 1, %s2961_s2  ;;  %s2965_s23 = sphi %s3094_s23, %s39_s23   ;;  %s2961_s2 = sphi %s3092_s2, %s3728_s2   ;;  %s2957_s22 = sphi %s3090_s22, %s3727_s22   ;;  %s2953_s1 = sphi %s3088_s1, %s3726_s1   ;;  %s2949_s21 = sphi %s3086_s21, %s3730_s21   ;;  %s2945_s20 = sphi %s3084_s20, %s3729_s20  }
  0x1b   : > { %3683 = sst [smem:[#allocation21_spill]] %s2961_s2  ;;  %s230_s24 = sadd.s32 1, %s2953_s1 }
  0x1c   : > { %p53_p0 = scmp.ge.s32.totalorder %s51_s18, 2  ;;  %p237_p1 = scmp.ne.s32.totalorder %s2953_s1, %s2949_s21 }
  0x1d   : > { %p238_p2 = scmp.eq.s32.totalorder %s2965_s23, 0  ;;  %p2585_p5 = scmp.lt.s32.totalorder %s2965_s23, 2 }
  0x1e   : > { %s3732_s18 = smov (%p53_p0, %s51_s18), 0  ;;  %s632_s27 = sand.u32 1, %s2953_s1  }
  0x1f   : > { %3684 = sst [smem:[#allocation22_spill]] %s3732_s18  ;;  %p3121_p3 = por %p238_p2, %p237_p1 }
  0x20   : > { %s227_s3 = ssub.s32 %s2961_s2, %s3732_s18  ;;  %s3133_s29 = sshll.u32 %s632_s27, 6 }
  0x21   : > { %p228_p4 = scmp.eq.s32.totalorder %s227_s3, 0  ;;  %s3136_s0 = sshll.u32 %s2961_s2, 10 }
  0x22   : > { %s3687_s7 = sld [smem:[#allocation31_spill]]  ;;  %s634_s3 = scalar_lea.vmem [#allocation8], %s3133_s29 }
  0x23   : > { %s3131_s28 = scalar_select %p228_p4, %s2953_s1, %s230_s24  }
  0x24   : > { %s641_s26 = sshll.u32 %s634_s3, 4  ;;  %p3149_p6 = pnand %p2585_p5, %p3121_p3  ;;  %s3145_s26 = int_to_ptr.vmem [resolvable:$true] %s641_s26 }
  0x25   : > { %3686 = sst [smem:[#allocation23_spill]] %s3131_s28  ;;  %s3689_s11 = sld [smem:[#allocation34_spill]] }
  0x26   : > { %s3688_s24 = scalar_select %p3149_p6, 1, 0 }
  0x27   : > { %s3690_s30 = sand.u32 1, %s2965_s23   ;;  %p3167_p8 = pneg %p3149_p6 }
  0x28   : > { %s3142_s16 = scalar_lea.hbm %s3687_s7, %s3136_s0  ;;  %s3161_s2 = scalar_lea.sflag [#allocation9], %s3690_s30 }
  0x29   : > { %s2727_s28 = scalar_lea.hbm %s3142_s16, 1024  ;;  %s2732_s18 = scalar_lea.hbm %s3687_s7, 2048 }
  0x2a   : > { %p2728_p7 = scmp.ne.s32.totalorder %s3142_s16, %s2727_s28  ;;  %p2733_p11 = scmp.lt.u32.totalorder %s3142_s16, %s3687_s7 }
  0x2b   : > { %s3157_s19 = scalar_lea.hbm %s3689_s11, %s3136_s0  ;;  %p2734_p12 = scmp.lt.u32.totalorder %s2732_s18, %s2727_s28 }
  0x2c   : > { %s3691_s3 = scalar_select %p3167_p8, 1, 0 }
  0x2d   : > { %p2730_p9 = pnand %p3167_p8, %p2728_p7  ;;  %p2735_p13 = por %p2734_p12, %p2733_p11 }
  0x2e   : > { %p2736_p0 = scmp.lt.u32.totalorder %s2727_s28, %s3142_s16 }
  0x2f   : > { %p2731_p10 = pneg %p2730_p9 }
  0x30   : > { %p2737_p1 = por %p2736_p0, %p2735_p13 }
  0x32   : > { %p2738_p2 = pnand %p2737_p1, %p2731_p10 }
  0x34   : > { %2741 = shalt.err (!%p2738_p2)
}
  0x35   : > { %s2742_s30 = scalar_lea.vmem %s3145_s26, 1024  ;;  %s2967_s1 = smov [#allocation8]  }
  0x36   : > { %p2743_p3 = scmp.ne.s32.totalorder %s3145_s26, %s2742_s30  ;;  %s2747_s25 = sshll.u32 %s2967_s1, 4  ;;  %s2748_s25 = int_to_ptr.vmem [resolvable:$false] %s2747_s25 }
  0x37   : > { %s2749_s17 = scalar_lea.vmem %s2748_s25, 2048  ;;  %p2750_p7 = scmp.lt.s32.totalorder %s3145_s26, %s2748_s25 }
  0x38   : > { %p2745_p4 = pnand %p2743_p3, %p3167_p8  ;;  %p2751_p9 = scmp.lt.s32.totalorder %s2749_s17, %s2742_s30 }
  0x3a   : > { %p2746_p5 = pneg %p2745_p4  ;;  %p2752_p11 = por %p2751_p9, %p2750_p7 }
  0x3c   : > { %p2753_p12 = pnand %p2752_p11, %p2746_p5 }
  0x3e   : > { %2756 = shalt.err (!%p2753_p12)
}
  0x3f   : > { %s3653_s28 = smov 64   ;;  %s3655_s18 = smov 4  }
  0x40   : > { %2573 = dma.hbm_to_vmem [thread:$0]  (!%p3149_p6), %s3142_s16, 1024, %s3145_s26, %s3161_s2, %s3653_s28, %s3653_s28, %s3655_s18  }
  0x41   : > { %s688_s27 = scalar_lea.vmem [#allocation11], %s3133_s29  ;;  %s3692_s1 = sand.u32 1, %s2965_s23  }
  0x42   : > { %s695_s30 = sshll.u32 %s688_s27, 4  ;;  %s3199_s25 = scalar_lea.sflag [#allocation12], %s3692_s1  ;;  %s3195_s30 = int_to_ptr.vmem [resolvable:$true] %s695_s30 }
  0x43   : > { %s2757_s17 = scalar_lea.hbm %s3157_s19, 1024  ;;  %s2762_s4 = scalar_lea.hbm %s3689_s11, 2048 }
  0x44   : > { %p2758_p10 = scmp.ne.s32.totalorder %s3157_s19, %s2757_s17  ;;  %p2763_p1 = scmp.lt.u32.totalorder %s3157_s19, %s3689_s11 }
  0x45   : > { %p2764_p2 = scmp.lt.u32.totalorder %s2762_s4, %s2757_s17  ;;  %p2766_p4 = scmp.lt.u32.totalorder %s2757_s17, %s3157_s19 }
  0x46   : > { %p2760_p13 = pnand %p2758_p10, %p3167_p8 }
  0x47   : > { %p2765_p3 = por %p2764_p2, %p2763_p1 }
  0x48   : > { %p2761_p0 = pneg %p2760_p13 }
  0x49   : > { %p2767_p5 = por %p2766_p4, %p2765_p3 }
  0x4b   : > { %p2768_p7 = pnand %p2767_p5, %p2761_p0 }
  0x4d   : > { %2771 = shalt.err (!%p2768_p7)
}
  0x4e   : > { %s2772_s16 = scalar_lea.vmem %s3195_s30, 1024  ;;  %s2970_s5 = smov [#allocation11]  }
  0x4f   : > { %p2773_p9 = scmp.ne.s32.totalorder %s3195_s30, %s2772_s16  ;;  %s2777_s7 = sshll.u32 %s2970_s5, 4  ;;  %s2778_s7 = int_to_ptr.vmem [resolvable:$false] %s2777_s7 }
  0x50   : > { %s2779_s12 = scalar_lea.vmem %s2778_s7, 2048  ;;  %p2780_p10 = scmp.lt.s32.totalorder %s3195_s30, %s2778_s7 }
  0x51   : > { %p2775_p11 = pnand %p2773_p9, %p3167_p8  ;;  %p2781_p13 = scmp.lt.s32.totalorder %s2779_s12, %s2772_s16 }
  0x53   : > { %p2776_p12 = pneg %p2775_p11  ;;  %p2782_p1 = por %p2781_p13, %p2780_p10 }
  0x55   : > { %p2783_p2 = pnand %p2782_p1, %p2776_p12 }
  0x57   : > { %2786 = shalt.err (!%p2783_p2)
}
  0x58   : > { %2579 = dma.hbm_to_vmem [thread:$0]  (!%p3149_p6), %s3157_s19, 1024, %s3195_s30, %s3199_s25, %s3653_s28, %s3653_s28, %s3655_s18  }
  0x59   : > { %s3652_s4 = sadd.s32 4294967295, %s2965_s23   ;;  %p243_p0 = scmp.ne.s32.totalorder %s2949_s21, %s2945_s20 }
  0x5a   : > { %p3231_p3 = scmp.eq.s32.totalorder %s3652_s4, 0  ;;  %p2207_p4 = scmp.ge.s32.totalorder %s2965_s23, 1 }
  0x5b   : > { %p541_p5 = scmp.lt.s32.totalorder %s2965_s23, 3  ;;  %s2971_s20 = smov [#allocation6]  }
  0x5c   : > { %s3693_s14 = scalar_select %p3231_p3, 1, 0 }
  0x5d   : > { %p3239_p7 = por %p3231_p3, %p243_p0  ;;  %p3243_p9 = pnand %p2207_p4, %p541_p5 }
  0x5e   : > { %s556_s27 = sshll.u32 %s2971_s20, 4  ;;  %s2972_s30 = smov [#allocation14]   ;;  %s557_s27 = int_to_ptr.vmem [resolvable:$true] %s556_s27 }
  0x5f   : > { %s3694_s26 = scalar_select %p3239_p7, 1, 0 }
  0x60   : > { %s3695_s19 = scalar_select %p3243_p9, 1, 0 }
  0x61   : > { %p2563_p11 = pneg %p3243_p9  ;;  %s599_s1 = sshll.u32 %s2972_s30, 4  ;;  %s3249_s1 = int_to_ptr.vmem [resolvable:$true] %s599_s1 }
  0x62   : > { %s3697_s9 = sld [smem:[#allocation32_spill]]  ;;  %s661_s12 = scalar_lea.vmem [#allocation10], %s3133_s29 }
  0x63   : > { %p3253_p12 = pnand %p2563_p11, %p3231_p3  ;;  %s668_s20 = sshll.u32 %s661_s12, 4  ;;  %s3264_s20 = int_to_ptr.vmem [resolvable:$true] %s668_s20 }
  0x64   : > { %s3698_s28 = sld [smem:[#allocation24_spill]] }
  0x65   : > { %p2789_p13 = pneg %p3253_p12 }
  0x68   : > { %s3261_s7 = scalar_lea.hbm %s3697_s9, %s3136_s0 }
  0x6a   : > { %s2787_s18 = scalar_lea.hbm %s3698_s28, 16 }
  0x6b   : > { %p2788_p10 = scmp.ne.s32.totalorder %s3698_s28, %s2787_s18  ;;  %p2794_p0 = scmp.lt.u32.totalorder %s2787_s18, %s3698_s28 }
  0x6d   : > { %p2790_p1 = pnand %p2789_p13, %p2788_p10 }
  0x6f   : > { %p2791_p2 = pneg %p2790_p1 }
  0x71   : > { %p2796_p4 = pnand %p2794_p0, %p2791_p2 }
  0x73   : > { %2799 = shalt.err (!%p2796_p4)
}
  0x74   : > { %s2800_s12 = scalar_lea.vmem %s557_s27, 16  ;;  %s2807_s10 = scalar_lea.vmem %s557_s27, 32 }
  0x75   : > { %p2801_p5 = scmp.ne.s32.totalorder %s557_s27, %s2800_s12  ;;  %p2808_p3 = scmp.lt.s32.totalorder %s557_s27, %s557_s27 }
  0x76   : > { %p2809_p9 = scmp.lt.s32.totalorder %s2807_s10, %s2800_s12 }
  0x77   : > { %p2803_p11 = pnand %p2801_p5, %p2789_p13 }
  0x78   : > { %p2810_p6 = por %p2809_p9, %p2808_p3 }
  0x79   : > { %p2804_p7 = pneg %p2803_p11 }
  0x7b   : > { %p2811_p8 = pnand %p2810_p6, %p2804_p7 }
  0x7d   : > { %2814 = shalt.err (!%p2811_p8)
}
  0x7e   : > { %2566 = dma.hbm_to_vmem [thread:$0]  (!%p3253_p12), %s3698_s28, 16, %s557_s27, [#allocation7]  }
  0x7f   : > { %s2815_s16 = scalar_lea.hbm %s3639_s15, 1024 }
  0x80   : > { %p2816_p10 = scmp.ne.s32.totalorder %s3639_s15, %s2815_s16  ;;  %p2822_p8 = scmp.lt.u32.totalorder %s2815_s16, %s3639_s15 }
  0x82   : > { %p2818_p3 = pnand %p2816_p10, %p2789_p13 }
  0x84   : > { %p2819_p6 = pneg %p2818_p3 }
  0x86   : > { %p2824_p7 = pnand %p2822_p8, %p2819_p6 }
  0x88   : > { %2827 = shalt.err (!%p2824_p7)
}
  0x89   : > { %s2828_s27 = scalar_lea.vmem %s3249_s1, 1024  ;;  %p2836_p0 = scmp.lt.s32.totalorder %s3249_s1, %s3249_s1 }
  0x8a   : > { %p2829_p9 = scmp.ne.s32.totalorder %s3249_s1, %s2828_s27  ;;  %p2837_p4 = scmp.lt.s32.totalorder %s2828_s27, %s2828_s27 }
  0x8c   : > { %p2831_p1 = pnand %p2829_p9, %p2789_p13  ;;  %p2838_p5 = por %p2837_p4, %p2836_p0 }
  0x8e   : > { %p2832_p2 = pneg %p2831_p1 }
  0x90   : > { %p2839_p11 = pnand %p2838_p5, %p2832_p2 }
  0x92   : > { %2842 = shalt.err (!%p2839_p11)
}
  0x93   : > { %s3699_s6 = smov 4   ;;  %s3700_s11 = smov 64  }
  0x94   : > { %2569 = dma.hbm_to_vmem [thread:$0]  (!%p3253_p12), %s3639_s15, 1024, %s3249_s1, [#allocation15], %s3700_s11, %s3700_s11, %s3699_s6  }
  0x95   : > { %s2843_s30 = scalar_lea.hbm %s3261_s7, 1024  ;;  %p3701_p10 = scmp.ne.s32.totalorder %s3691_s3, 0 }
  0x96   : > { %p2844_p13 = scmp.ne.s32.totalorder %s3261_s7, %s2843_s30  ;;  %s2848_s5 = scalar_lea.hbm %s3697_s9, 2048 }
  0x97   : > { %p2849_p8 = scmp.lt.u32.totalorder %s3261_s7, %s3697_s9  ;;  %p2850_p7 = scmp.lt.u32.totalorder %s2848_s5, %s2843_s30 }
  0x98   : > { %p2846_p3 = pnand %p2844_p13, %p3701_p10  ;;  %p2852_p1 = scmp.lt.u32.totalorder %s2843_s30, %s3261_s7 }
  0x99   : > { %p2851_p9 = por %p2850_p7, %p2849_p8 }
  0x9a   : > { %p2847_p6 = pneg %p2846_p3 }
  0x9b   : > { %p2853_p2 = por %p2852_p1, %p2851_p9 }
  0x9d   : > { %p2854_p0 = pnand %p2853_p2, %p2847_p6 }
  0x9f   : > { %2857 = shalt.err (!%p2854_p0)
}
  0xa0   : > { %s2858_s1 = scalar_lea.vmem %s3264_s20, 1024  ;;  %s2973_s27 = smov [#allocation10]  }
  0xa1   : > { %p2859_p12 = scmp.ne.s32.totalorder %s3264_s20, %s2858_s1  ;;  %s2863_s4 = sshll.u32 %s2973_s27, 4  ;;  %s2864_s4 = int_to_ptr.vmem [resolvable:$false] %s2863_s4 }
  0xa2   : > { %s2865_s18 = scalar_lea.vmem %s2864_s4, 2048  ;;  %p2866_p11 = scmp.lt.s32.totalorder %s3264_s20, %s2864_s4 }
  0xa3   : > { %p2861_p4 = pnand %p2859_p12, %p3701_p10  ;;  %p2867_p13 = scmp.lt.s32.totalorder %s2865_s18, %s2858_s1 }
  0xa5   : > { %p2862_p5 = pneg %p2861_p4  ;;  %p2868_p3 = por %p2867_p13, %p2866_p11 }
  0xa7   : > { %p2869_p8 = pnand %p2868_p3, %p2862_p5 }
  0xa9   : > { %2872 = shalt.err (!%p2869_p8)
}
  0xaa   : > { %p3702_p6 = scmp.ne.s32.totalorder %s3688_s24, 0  ;;  %s3703_s13 = sld [smem:[#allocation36_spill]] }
  0xab   : > { %s715_s5 = scalar_lea.vmem [#allocation13], %s3133_s29 }
  0xac   : > { %2576 = dma.hbm_to_vmem [thread:$0]  (!%p3702_p6), %s3261_s7, 1024, %s3264_s20, %s3161_s2, %s3700_s11, %s3700_s11, %s3699_s6  }
  0xad   : > { %s722_s12 = sshll.u32 %s715_s5, 4  ;;  %s3348_s12 = int_to_ptr.vmem [resolvable:$true] %s722_s12 }
  0xb0   : > { %s3345_s17 = scalar_lea.hbm %s3703_s13, %s3136_s0  ;;  %s2878_s7 = scalar_lea.hbm %s3703_s13, 2048 }
  0xb1   : > { %s2873_s10 = scalar_lea.hbm %s3345_s17, 1024  ;;  %p2879_p2 = scmp.lt.u32.totalorder %s3345_s17, %s3703_s13 }
  0xb2   : > { %p2874_p7 = scmp.ne.s32.totalorder %s3345_s17, %s2873_s10  ;;  %p2880_p0 = scmp.lt.u32.totalorder %s2878_s7, %s2873_s10 }
  0xb3   : > { %p2882_p4 = scmp.lt.u32.totalorder %s2873_s10, %s3345_s17 }
  0xb4   : > { %p2876_p9 = pnand %p2874_p7, %p3701_p10  ;;  %p2881_p12 = por %p2880_p0, %p2879_p2 }
  0xb6   : > { %p2877_p1 = pneg %p2876_p9  ;;  %p2883_p5 = por %p2882_p4, %p2881_p12 }
  0xb8   : > { %p2884_p11 = pnand %p2883_p5, %p2877_p1 }
  0xba   : > { %2887 = shalt.err (!%p2884_p11)
}
  0xbb   : > { %s2888_s29 = scalar_lea.vmem %s3348_s12, 1024  ;;  %s2974_s27 = smov [#allocation13]  }
  0xbc   : > { %p2889_p13 = scmp.ne.s32.totalorder %s3348_s12, %s2888_s29  ;;  %s2893_s4 = sshll.u32 %s2974_s27, 4  ;;  %s2894_s4 = int_to_ptr.vmem [resolvable:$false] %s2893_s4 }
  0xbd   : > { %s2895_s18 = scalar_lea.vmem %s2894_s4, 2048  ;;  %p2896_p7 = scmp.lt.s32.totalorder %s3348_s12, %s2894_s4 }
  0xbe   : > { %p2891_p3 = pnand %p2889_p13, %p3701_p10  ;;  %p2897_p9 = scmp.lt.s32.totalorder %s2895_s18, %s2888_s29 }
  0xc0   : > { %p2892_p8 = pneg %p2891_p3  ;;  %p2898_p2 = por %p2897_p9, %p2896_p7 }
  0xc2   : > { %p2899_p0 = pnand %p2898_p2, %p2892_p8 }
  0xc4   : > { %2902 = shalt.err (!%p2899_p0)
}
  0xc5   : > { %2582 = dma.hbm_to_vmem [thread:$0]  (!%p3702_p6), %s3345_s17, 1024, %s3348_s12, %s3199_s25, %s3700_s11, %s3700_s11, %s3699_s6  }
  0xc6   : > { %p3704_p10 = scmp.ne.s32.totalorder %s3695_s19, 0 }
  0xc7   : > { %p3705_p1 = scmp.ne.s32.totalorder (!%p3704_p10), %s3693_s14, 0 }
  0xc8   : > { %740 = sbr.rel (%p3704_p10) target bundleno = 1924 (0x784), region = 96 }
  0xcf   : > { %2928 = dma.done.wait (%p3705_p1), [#allocation7], 16  }
  0xd0   : > { %2930 = vsyncadd (%p3705_p1), [#allocation7], 4294967280  ;;  %s3706_s3 = sadd.s32 4294967295, %s2965_s23   ;;  %s748_s30 = sand.u32 1, %s2949_s21  }
  0xd1   : > { %s746_s24 = sand.u32 1, %s3706_s3   ;;  %s2228_s16 = sshll.u32 %s748_s30, 6 }
  0xd2   : > { %s747_s5 = scalar_lea.sflag [#allocation9], %s746_s24  ;;  %s3384_s10 = scalar_lea.vmem [#allocation8], %s2228_s16 }
  0xd3   : > { %p3707_p6 = scmp.ne.s32.totalorder %s3694_s26, 0 }
  0xd5   : > { %2932 = dma.done.wait (%p3707_p6), %s747_s5, 2048  }
  0xd6   : > { %2934 = vsyncadd (%p3707_p6), %s747_s5, 4294965248  ;;  %s3390_s25 = scalar_lea.vmem [#allocation10], %s2228_s16  ;;  %s765_s19 = scalar_lea.sflag [#allocation12], %s746_s24 }
  0xd7   : > { %s3392_s6 = scalar_lea.vmem [#allocation11], %s2228_s16 }
  0xd8   : > { %2936 = dma.done.wait (%p3707_p6), %s765_s19, 2048  }
  0xd9   : > { %2938 = vsyncadd (%p3707_p6), %s765_s19, 4294965248  ;;  %s3398_s11 = scalar_lea.vmem [#allocation13], %s2228_s16 }
  0xda   : > { %2940 = dma.done.wait (%p3705_p1), [#allocation15], 1024  }
  0xdb   : > { %2942 = vsyncadd (%p3705_p1), [#allocation15], 4294966272  ;;  %p896_p12 = scmp.lt.s32.totalorder %s2957_s22, 1  ;;  %s3708_s0 = sld [smem:[#allocation30_spill]] }
  0xdc   : > { %s3709_s4 = sld [smem:[#allocation33_spill]]  ;;  %s3710_s30 = sld [smem:[#allocation35_spill]] }
  0xdd   : > { %s3406_s17 = scalar_select %p896_p12, %s2957_s22, 1 }
  0xde   : > { %s3711_s9 = sld [smem:[#allocation37_spill]]  ;;  %p2235_p4 = scmp.ne.s32.totalorder %s2957_s22, 0 }
  0xdf   : > { %s2320_s26 = sshll.u32 %s3406_s17, 6  ;;  %s903_s2 = scalar_lea.vmem %s3632_s8, %s3406_s17 }
  0xe0   : > { %921 = sbr.rel (%p2235_p4) target bundleno = 232 (0xe8), region = 128  ;;  %s3712_s7 = sld [smem:[#allocation26_spill]] (!%p2235_p4) }
  0xe1   : > { %s3416_s14 = scalar_lea.vmem %s3708_s0, %s2320_s26 }
  0xe2   : > { %s906_s18 = scalar_lea.vmem %s3709_s4, %s3406_s17  ;;  %s909_s16 = scalar_lea.vmem %s3710_s30, %s3406_s17 }
  0xe4   : > { %s912_s13 = scalar_lea.vmem %s3711_s9, %s3406_s17 }
  0xe6   : > { %v922_v1 = vld [vmem:[%s3712_s7] sm:$0xff] (!%p2235_p4) }
  0xe7   : > { %923 = vst [vmem:[#allocation2] sm:$0xff] %v922_v1 }
  0xe8 PF: > { %v2648_v2 = vld [vmem:[%s3384_s10] sm:$0xff]   ;;  %v2649_v3 = vld [vmem:[%s3384_s10 + $0x8] sm:$0xff]   ;;  %v2975_v4 = vmov 0.0   ;;  %vm2976_vm0 = vmmov 0   ;;  %v2977_v5 = vmov 0   ;;  %v2650_v6 = vld [vmem:[%s3384_s10 + $0x10] sm:$0xff]   ;;  %v1337_v38 = vlaneseq }
  0xe9   : > { %2392 = vmatprep.subr.bf16.mxu0 %v2975_v4  ;;  %2412 = vmatprep.subr.bf16.mxu1 %v2648_v2  ;;  %v2655_v7 = vld [vmem:[%s3416_s14] sm:$0xff]   ;;  %s3713_s20 = sld [smem:[#allocation27_spill]]  ;;  %v2658_v10 = vld [vmem:[%s3416_s14 + $0x8] sm:$0xff]   ;;  %v2660_v12 = vld [vmem:[%s3416_s14 + $0x10] sm:$0xff]   ;;  %s3715_s4 = sld [smem:[#allocation25_spill]]  ;;  %vm1363_vm3 = vcmask 64512  }
  0xea   : > { %2408 = vmatprep.mubr.msk.bf16.mxu0 %vm2976_vm0, %v2975_v4  ;;  %2413 = vmatpush3.bf16.msra.mxu1 %v2648_v2  ;;  %v2651_v8 = vld [vmem:[%s3384_s10 + $0x18] sm:$0xff]   ;;  %v2652_v11 = vld [vmem:[%s3384_s10 + $0x20] sm:$0xff]   ;;  %v2653_v13 = vld [vmem:[%s3384_s10 + $0x28] sm:$0xff]   ;;  %s3716_s1 = sld [smem:[#allocation28_spill]]  ;;  %v1338_v39 = vand.u32 127, %v1337_v38  ;;  %vm1370_vm5 = vcmask 1043456  }
  0xeb   : > { %2646 = vset.pattern.permute.xlu0 %v2977_v5  ;;  %2414 = vmatprep.subr.bf16.mxu1 %v2649_v3  ;;  %v2661_v14 = vld [vmem:[%s3416_s14 + $0x18] sm:$0xff]   ;;  %v2662_v18 = vld [vmem:[%s3416_s14 + $0x20] sm:$0xff]   ;;  %v2663_v23 = vld [vmem:[%s3416_s14 + $0x28] sm:$0xff]   ;;  %vm1439_vm7 = vcmask 195584   ;;  %p2294_p5 = scmp.ne.s32.totalorder %s2957_s22, 1 }
  0xec   : > { %2647 = vset.pattern.permute.xlu1 %v2977_v5  ;;  %2393 = vmatpush3.bf16.msra.mxu0 %v2655_v7  ;;  %v2654_v15 = vld [vmem:[%s3384_s10 + $0x30] sm:$0xff]   ;;  %v2656_v21 = vld [vmem:[%s3384_s10 + $0x38] sm:$0xff]   ;;  %v2664_v25 = vld [vmem:[%s3416_s14 + $0x30] sm:$0xff]   ;;  %vm2980_vm8 = vmmov (!%p2294_p5), 0   ;;  %s3722_s17 = sld [smem:[#allocation39_spill]] (!%p2294_p5)  ;;  %s3723_s5 = sld [smem:[#allocation38_spill]] (!%p2294_p5) }
  0xed   : > { %2394 = vmatprep.subr.bf16.mxu0 %v2975_v4  ;;  %v2665_v27 = vld [vmem:[%s3416_s14 + $0x38] sm:$0xff]   ;;  %v2666_v30 = vld [vmem:[%s3390_s25] sm:$0xff]   ;;  %v2669_v33 = vld [vmem:[%s3390_s25 + $0x18] sm:$0xff]   ;;  %vm1976_vm9 = vcmask (!%p2294_p5), 7168  }
  0xee   : > { %2415 = vmatpush3.bf16.msra.mxu1 %v2649_v3  ;;  %v3483_v28 = vld [vmem:[#allocation2] sm:$0xff]  ;;  %v2667_v31 = vld [vmem:[%s3390_s25 + $0x8] sm:$0xff]   ;;  %v2670_v34 = vld [vmem:[%s3390_s25 + $0x20] sm:$0xff]  }
  0xef   : > { %2416 = vmatprep.subr.bf16.mxu1 %v2650_v6  ;;  %s3714_s0 = smov %s3713_s20  ;;  %v2657_v9 = vld [vmem:[%s3713_s20] sm:$0xff]   ;;  %v1341_v17 = vld [vmem:[%s3715_s4 + $0x10] sm:$0xff]  ;;  %v1340_v19 = vld [vmem:[%s3715_s4 + $0x8] sm:$0xff]  ;;  %v925_v29 = vpack.c.bf16 %v3483_v28, %v3483_v28 }
  0xf0   : > { %2428 = vmatprep.mubr.bf16.mxu1 %v2657_v9  ;;  %2395 = vmatpush3.bf16.msra.mxu0 %v2658_v10  ;;  %v1339_v16 = vld [vmem:[%s3715_s4] sm:$0xff]  ;;  %s3717_s7 = smov %s3716_s1  ;;  %v2659_v26 = vld [vmem:[%s3714_s0 + $0x8] ss:$0 sps:$4 sm:$0xff]   ;;  %v2671_v35 = vld [vmem:[%s3390_s25 + $0x28] sm:$0xff]  }
  0xf1   : > { %2396 = vmatprep.subr.bf16.mxu0 %v2975_v4  ;;  %1343 = vperm.xlu0 %2646, %v1339_v16   ;;  %v1316_v20 = vld [vmem:[%s3716_s1] sm:$0xff]  ;;  %v1317_v22 = vld [vmem:[%s3717_s7 + $0x8] sm:$0xff]  ;;  %v1318_v24 = vld [vmem:[%s3717_s7 + $0x10] sm:$0xff]  ;;  %s3721_s1 = sld [smem:[#allocation29_spill]] (!%p2294_p5) }
  0xf2   : > { %2417 = vmatpush3.bf16.msra.mxu1 %v2650_v6  ;;  %1349 = vperm.xlu1 %2647, %v1341_v17   ;;  %v2668_v32 = vld [vmem:[%s3390_s25 + $0x10] sm:$0xff]   ;;  %v2673_v41 = vld [vmem:[%s3390_s25 + $0x38] sm:$0xff]  }
  0xf3   : > { %2418 = vmatprep.subr.bf16.mxu1 %v2651_v8  ;;  %v2672_v37 = vld [vmem:[%s3390_s25 + $0x30] sm:$0xff]  }
  0xf4   : > { %2397 = vmatpush3.bf16.msra.mxu0 %v2660_v12  ;;  %v2244_v45 = vld [vmem:[%s903_s2] ss:$0 sm:$0xff] }
  0xf5   : > { %2398 = vmatprep.subr.bf16.mxu0 %v2975_v4  ;;  %1346 = vperm.xlu0 %2646, %v1340_v19  }
  0xf6   : > { %2419 = vmatpush3.bf16.msra.mxu1 %v2651_v8  ;;  %1321 = vperm.xlu1 %2647, %v1316_v20  }
  0xf7   : > { %2420 = vmatprep.subr.bf16.mxu1 %v2652_v11 }
  0xf8   : > { %2399 = vmatpush3.bf16.msra.mxu0 %v2661_v14 }
  0xf9   : > { %2400 = vmatprep.subr.bf16.mxu0 %v2975_v4  ;;  %1326 = vperm.xlu0 %2646, %v1317_v22  }
  0xfa   : > { %2421 = vmatpush3.bf16.msra.mxu1 %v2652_v11  ;;  %1331 = vperm.xlu1 %2647, %v1318_v24  }
  0xfb   : > { %2422 = vmatprep.subr.bf16.mxu1 %v2653_v13 }
  0xfc   : > { %2401 = vmatpush3.bf16.msra.mxu0 %v2662_v18 }
  0xfd   : > { %2402 = vmatprep.subr.bf16.mxu0 %v2975_v4 }
  0xfe   : > { %2423 = vmatpush3.bf16.msra.mxu1 %v2653_v13 }
  0xff   : > { %2424 = vmatprep.subr.bf16.mxu1 %v2654_v15 }
 0x100   : > { %2403 = vmatpush3.bf16.msra.mxu0 %v2663_v23 }
 0x101   : > { %2404 = vmatprep.subr.bf16.mxu0 %v2975_v4 }
 0x102   : > { %2425 = vmatpush3.bf16.msra.mxu1 %v2654_v15 }
 0x103   : > { %2426 = vmatprep.subr.bf16.mxu1 %v2656_v21 }
 0x104   : > { %2405 = vmatpush3.bf16.msra.mxu0 %v2664_v25 }
 0x105   : > { %2406 = vmatprep.subr.bf16.mxu0 %v2975_v4 }
 0x106   : > { %2427 = vmatpush3.bf16.msra.mxu1 %v2656_v21 }
 0x108   : > { %2407 = vmatpush3.bf16.msra.mxu0 %v2665_v27 }
 0x109   : > { %2429 = vmatmul.mubr.bf16.vlgmr.msra.gmra.mrb[0].mxu1 %v2659_v26  ;;  %2432 = vmatprep.subr.bf16.mxu0 %v2666_v30 }
 0x10b   : > { %2409 = vmatmul.mubr.bf16.vlgmr.msra.gmra.mrb[0].mxu0 %v925_v29 }
 0x10c   : > { %2433 = vmatpush3.bf16.msra.mxu0 %v2666_v30 }
 0x10d   : > { %2434 = vmatprep.subr.bf16.mxu0 %v2667_v31 }
 0x110   : > { %2435 = vmatpush3.bf16.msra.mxu0 %v2667_v31 }
 0x111   : > { %2436 = vmatprep.subr.bf16.mxu0 %v2668_v32 }
 0x114   : > { %2437 = vmatpush3.bf16.msra.mxu0 %v2668_v32 }
 0x115   : > { %2438 = vmatprep.subr.bf16.mxu0 %v2669_v33 }
 0x118   : > { %2439 = vmatpush3.bf16.msra.mxu0 %v2669_v33 }
 0x119   : > { %2440 = vmatprep.subr.bf16.mxu0 %v2670_v34 }
 0x11c   : > { %2441 = vmatpush3.bf16.msra.mxu0 %v2670_v34 }
 0x11d   : > { %2442 = vmatprep.subr.bf16.mxu0 %v2671_v35 }
 0x120   : > { %2443 = vmatpush3.bf16.msra.mxu0 %v2671_v35 }
 0x121   : > { %2444 = vmatprep.subr.bf16.mxu0 %v2672_v37 }
 0x124   : > { %2445 = vmatpush3.bf16.msra.mxu0 %v2672_v37 }
 0x125   : > { %2446 = vmatprep.subr.bf16.mxu0 %v2673_v41 }
 0x128   : > { %2447 = vmatpush3.bf16.msra.mxu0 %v2673_v41 }
 0x129   : > { %2486 = vmatprep.subr.bf16.mxu0 %v2975_v4 }
 0x170   : > { %v1344_v36 = vpop.permute.xlu0 %1343 }
 0x171   : > { %vm1351_vm1 = vcmp.eq.s32.totalorder %v1338_v39, %v1344_v36  ;;  %v1350_v3 = vpop.permute.xlu1 %1349 }
 0x172   : > { %v2267_v42 = vsel %vm1351_vm1, 1.0, %v2975_v4  ;;  %vm1353_vm4 = vcmp.eq.s32.totalorder %v1338_v39, %v1350_v3  ;;  %v2680_v3 = vld [vmem:[%s3392_s6 + $0x30] sm:$0xff]  }
 0x173   : > { %v2269_v5 = vsel %vm1353_vm4, 1.0, %v2975_v4 }
 0x174   : > { %v1347_v40 = vpop.permute.xlu0 %1346  ;;  %v1361_v7 = vpack.c.bf16 %v2269_v5, %v2269_v5  ;;  %v2681_v5 = vld [vmem:[%s3392_s6 + $0x38] sm:$0xff]  }
 0x175   : > { %vm1352_vm2 = vcmp.eq.s32.totalorder %v1338_v39, %v1347_v40  ;;  %v1322_v37 = vpop.permute.xlu1 %1321  ;;  %v2258_v39 = vld [vmem:[%s906_s18] ss:$0 sm:$0xff] }
 0x176   : > { %v2268_v43 = vsel %vm1352_vm2, 1.0, %v2975_v4 }
 0x177   : > { %v1360_v44 = vpack.c.bf16 %v2268_v43, %v2267_v42 }
 0x179   : > { %2454 = vmatprep.mubr.msk.bf16.mxu1 %vm1363_vm3, %v1360_v44  ;;  %v1332_v43 = vpop.permute.xlu1 %1331 }
 0x1dc   : > { %v2430_v46 = vpop.f32.mrb[0].mxu1 }
 0x1dd   : > { %v1160_v47 = vadd.f32 %v2430_v46, %v2244_v45  ;;  %v1151_v48 = vpop.f32.mrb[1].mxu1 }
 0x1de   : > { %v1152_v49 = vadd.f32 %v2244_v45, %v1151_v48  ;;  %v2431_v50 = vpop.f32.mrb[2].mxu1  ;;  %v1024_v58 = vpop.f32.mrb[0].mxu0 }
 0x1df   : > { %v1170_v51 = vand.u32 2147483647, %v1160_v47  ;;  %v1154_v52 = vpop.f32.mrb[3].mxu1  ;;  %v1030_v60 = vpack.c.bf16 %v1024_v58, %v1024_v58  ;;  %v2410_v61 = vpop.f32.mrb[1].mxu0  ;;  %v1167_v17 = vmax.f32 %v1160_v47, 0.0  ;;  %v1426_v50 = vshrl.u32 %v1337_v38, 7 }
 0x1e0   : > { %v1168_v53 = vand.u32 2147483647, %v1152_v49  ;;  %v1155_v54 = vadd.f32 %v2244_v45, %v1154_v52  ;;  %v1027_v0 = vpop.f32.mrb[2].mxu0  ;;  %v1165_v19 = vmax.f32 %v1152_v49, 0.0  ;;  %v2674_v61 = vld [vmem:[%s3392_s6] sm:$0xff]  }
 0x1e1   : > { %v1173_v55 = vsub.f32 0.0, %v1170_v51  ;;  %1031 = vst [vmem:[#allocation3] sm:$0xf] %v1030_v60  ;;  %v2411_v1 = vpop.f32.mrb[3].mxu0  ;;  %v1327_v51 = vpop.permute.xlu0 %1326  ;;  %v2677_v0 = vld [vmem:[%s3392_s6 + $0x18] sm:$0xff]  }
 0x1e2   : > { %v1171_v56 = vsub.f32 0.0, %v1168_v53  ;;  %v1169_v57 = vand.u32 2147483647, %v1155_v54  ;;  %v1166_v24 = vmax.f32 %v1155_v54, 0.0  ;;  %v2272_v53 = vld [vmem:[#allocation6] ss:$0 sm:$0xff] }
 0x1e3   : > { %v1178_v59 = vmul.f32 1.442695, %v1173_v55  ;;  %vm1432_vm6 = vcmp.eq.s32.totalorder %v1426_v50, %v2272_v53  ;;  %v2678_v1 = vld [vmem:[%s3392_s6 + $0x20] sm:$0xff]   ;;  %v2714_v53 = vld [vmem:[#allocation14 + $0x38] sm:$0xff] (!%p2294_p5)  }
 0x1e4   : > { %v1174_v62 = vmul.f32 1.442695, %v1171_v56  ;;  %v1172_v63 = vsub.f32 0.0, %v1169_v57  ;;  %v2711_v50 = vld [vmem:[#allocation14 + $0x20] sm:$0xff] (!%p2294_p5)  }
 0x1e5   : > { %2690 = vpow2.f32 %v1178_v59  ;;  %v2273_v59 = vsel %vm1432_vm6, 1.0, %v2975_v4 }
 0x1e6   : > { %2692 = vpow2.f32 %v1174_v62  ;;  %v1176_v2 = vmul.f32 1.442695, %v1172_v63  ;;  %v1435_v60 = vpack.c.bf16 %v2273_v59, %v2273_v59  ;;  %v2675_v62 = vld [vmem:[%s3392_s6 + $0x8] sm:$0xff]   ;;  %v2676_v63 = vld [vmem:[%s3392_s6 + $0x10] sm:$0xff]   ;;  %v2716_v59 = vld [vmem:[%s3722_s17 + $0x8] sm:$0xff] (!%p2294_p5)  }
 0x1e8   : > { %2694 = vpow2.f32 %v1176_v2  ;;  %v1362_v6 = vld [vmem:[#allocation3] sm:$0xf]  ;;  %v2679_v2 = vld [vmem:[%s3392_s6 + $0x28] sm:$0xff]  }
 0x1e9   : > { %2546 = vmatprep.subr.msk.bf16.mxu1 %vm1370_vm5, %v1362_v6  ;;  %v1372_v8 = vsel %vm1370_vm5, %v1362_v6, 0 }
 0x1ea   : > { %2453 = vmatpush3.bf16.msra.mxu1 %v1372_v8 }
 0x1eb   : > { %2458 = vmatprep.subr.bf16.mxu1 %v2975_v4 }
 0x1ed   : > { %2455 = vmatmul.mubr.msk.bf16.vlgmr.msra.gmra.mrb[4].mxu1 %vm1363_vm3, %v1361_v7 }
 0x1ee   : > { %2462 = vmatprep.mubr.msk.bf16.mxu1 %vm2976_vm0, %v2975_v4 }
 0x1ef   : > { %v2691_v9 = vpop.eup %2690 }
 0x1f0   : > { %v2693_v10 = vpop.eup %2692  ;;  %v1182_v11 = vadd.f32 1.0, %v2691_v9 }
 0x1f1   : > { %v1180_v12 = vadd.f32 1.0, %v2693_v10 }
 0x1f2   : > { %v2695_v13 = vpop.eup %2694  ;;  %2696 = vlog2.f32 %v1182_v11  ;;  %v2682_v11 = vld [vmem:[%s3398_s11] sm:$0xff]  }
 0x1f3   : > { %2698 = vlog2.f32 %v1180_v12  ;;  %v1181_v14 = vadd.f32 1.0, %v2695_v13  ;;  %v2683_v12 = vld [vmem:[%s3398_s11 + $0x8] sm:$0xff]   ;;  %v2684_v13 = vld [vmem:[%s3398_s11 + $0x10] sm:$0xff]  }
 0x1f5   : > { %2700 = vlog2.f32 %v1181_v14  ;;  %v2685_v14 = vld [vmem:[%s3398_s11 + $0x18] sm:$0xff]  }
 0x1fc   : > { %v2697_v15 = vpop.eup %2696 }
 0x1fd   : > { %v2699_v16 = vpop.eup %2698  ;;  %v1188_v18 = vmul.f32 0.6931472, %v2697_v15  ;;  %v2686_v15 = vld [vmem:[%s3398_s11 + $0x20] sm:$0xff]  }
 0x1fe   : > { %v1184_v20 = vmul.f32 0.6931472, %v2699_v16  ;;  %v2687_v16 = vld [vmem:[%s3398_s11 + $0x28] sm:$0xff]  }
 0x1ff   : > { %v2701_v21 = vpop.eup %2700  ;;  %v1191_v22 = vadd.f32 %v1188_v18, %v1167_v17  ;;  %v2688_v17 = vld [vmem:[%s3398_s11 + $0x30] sm:$0xff]   ;;  %v2689_v18 = vld [vmem:[%s3398_s11 + $0x38] sm:$0xff]  }
 0x200   : > { %v1189_v23 = vadd.f32 %v1184_v20, %v1165_v19  ;;  %v1186_v25 = vmul.f32 0.6931472, %v2701_v21  ;;  %v2275_v19 = vld [vmem:[%s909_s16] ss:$0 sm:$0xff] }
 0x201   : > { %v2257_v27 = vadd.f32 -0.6931472, %v1191_v22 }
 0x202   : > { %v1190_v26 = vadd.f32 %v1186_v25, %v1166_v24  ;;  %v2255_v29 = vadd.f32 -0.6931472, %v1189_v23 }
 0x203   : > { %v1196_v32 = vpack.c.bf16 %v2257_v27, %v2257_v27 }
 0x204   : > { %v2256_v30 = vadd.f32 -0.6931472, %v1190_v26 }
 0x206   : > { %v1195_v31 = vpack.c.bf16 %v2256_v30, %v2255_v29 }
 0x208   : > { %2448 = vmatprep.mubr.bf16.mxu0 %v1195_v31 }
 0x209   : > { %2449 = vmatmul.mubr.bf16.vlgmr.msra.gmra.mrb[4].mxu0 %v1196_v32 }
 0x20a   : > { %2502 = vmatprep.mubr.msk.bf16.mxu0 %vm2976_vm0, %v2975_v4  ;;  %2487 = vmatpush3.bf16.msra.mxu0 %v2682_v11 }
 0x20b   : > { %2488 = vmatprep.subr.bf16.mxu0 %v2975_v4 }
 0x20e   : > { %2489 = vmatpush3.bf16.msra.mxu0 %v2683_v12 }
 0x20f   : > { %2490 = vmatprep.subr.bf16.mxu0 %v2975_v4 }
 0x212   : > { %2491 = vmatpush3.bf16.msra.mxu0 %v2684_v13 }
 0x213   : > { %2492 = vmatprep.subr.bf16.mxu0 %v2975_v4 }
 0x216   : > { %2493 = vmatpush3.bf16.msra.mxu0 %v2685_v14 }
 0x217   : > { %2494 = vmatprep.subr.bf16.mxu0 %v2975_v4 }
 0x21a   : > { %2495 = vmatpush3.bf16.msra.mxu0 %v2686_v15 }
 0x21b   : > { %2496 = vmatprep.subr.bf16.mxu0 %v2975_v4 }
 0x21e   : > { %2497 = vmatpush3.bf16.msra.mxu0 %v2687_v16 }
 0x21f   : > { %2498 = vmatprep.subr.bf16.mxu0 %v2975_v4 }
 0x222   : > { %2499 = vmatpush3.bf16.msra.mxu0 %v2688_v17 }
 0x223   : > { %2500 = vmatprep.subr.bf16.mxu0 %v2975_v4 }
 0x226   : > { %2501 = vmatpush3.bf16.msra.mxu0 %v2689_v18 }
 0x2c0   : > { %v2456_v33 = vpop.f32.mrb[4].mxu1 }
 0x2c1   : > { %v1408_v34 = vpop.f32.mrb[5].mxu1 }
 0x2c2   : > { %v2457_v35 = vpop.f32.mrb[6].mxu1 }
 0x2c3   : > { %v1411_v36 = vpop.f32.mrb[7].mxu1 }
 0x2dc   : > { %v2450_v40 = vpop.f32.mrb[4].mxu0 }
 0x2dd   : > { %v1311_v41 = vadd.f32 %v2450_v40, %v2258_v39  ;;  %v1302_v42 = vpop.f32.mrb[5].mxu0 }
 0x2de   : > { %v1303_v44 = vadd.f32 %v2258_v39, %v1302_v42  ;;  %v2451_v45 = vpop.f32.mrb[6].mxu0 }
 0x2df   : > { %v1336_v46 = vmul.f32 %v1332_v43, %v1311_v41  ;;  %v1305_v47 = vpop.f32.mrb[7].mxu0  ;;  %v2707_v45 = vld [vmem:[#allocation14] sm:$0xff] (!%p2294_p5)  }
 0x2e0   : > { %v1334_v48 = vmul.f32 %v1322_v37, %v1303_v44  ;;  %v1306_v49 = vadd.f32 %v2258_v39, %v1305_v47  ;;  %v3572_v44 = vld [vmem:[%s3721_s1] sm:$0xff] (!%p2294_p5)  ;;  %v2979_v47 = vmov (!%p2294_p5), 0.0   ;;  %s3724_s1 = sld [smem:[#allocation40_spill]] (!%p2294_p5) }
 0x2e1   : > { %v1424_v52 = vmul.f32 %v2456_v33, %v1336_v46  ;;  %v2978_v46 = vmov (!%p2294_p5), 0   ;;  %2506 = vmatprep.subr.bf16.mxu0 (!%p2294_p5), %v2979_v47 }
 0x2e2   : > { %v1422_v54 = vmul.f32 %v1408_v34, %v1334_v48  ;;  %v1335_v55 = vmul.f32 %v1327_v51, %v1306_v49  ;;  %2706 = vset.pattern.permute.xlu0 (!%p2294_p5), %v2978_v46  ;;  %v2708_v48 = vld [vmem:[#allocation14 + $0x8] sm:$0xff] (!%p2294_p5)   ;;  %v2710_v49 = vld [vmem:[#allocation14 + $0x18] sm:$0xff] (!%p2294_p5)  }
 0x2e3   : > { %v1438_v58 = vpack.c.bf16 %v1424_v52, %v1424_v52  ;;  %1737 = vperm.xlu0 (!%p2294_p5), %2706, %v3572_v44   ;;  %v2712_v51 = vld [vmem:[#allocation14 + $0x28] sm:$0xff] (!%p2294_p5)   ;;  %v2713_v52 = vld [vmem:[#allocation14 + $0x30] sm:$0xff] (!%p2294_p5)  }
 0x2e4   : > { %v1423_v56 = vmul.f32 %v1411_v36, %v1335_v55  ;;  %v2285_v36 = vld [vmem:[%s912_s13] ss:$0 sm:$0xff] }
 0x2e5   : > { %v1444_v38 = vsel %vm1370_vm5, %v1438_v58, 0  ;;  %v2715_v58 = vld [vmem:[%s3722_s17] sm:$0xff] (!%p2294_p5)  }
 0x2e6   : > { %v1437_v57 = vpack.c.bf16 %v1423_v56, %v1422_v54 }
 0x2e8   : > { %2459 = vmatpush3.bf16.msra.mxu1 %v1437_v57 }
 0x2e9   : > { %2460 = vmatprep.subr.bf16.mxu1 %v2975_v4 }
 0x2ec   : > { %2461 = vmatpush3.bf16.msra.mxu1 %v1444_v38  ;;  %v2717_v38 = vld [vmem:[%s3722_s17 + $0x10] sm:$0xff] (!%p2294_p5)  }
 0x2ed   : > { %2466 = vmatprep.subr.bf16.mxu1 %v2975_v4 }
 0x2ef   : > { %2463 = vmatmul.mubr.msk.bf16.vlgmr.msra.gmra.mrb[8].mxu1 %vm1439_vm7, %v1435_v60  ;;  %v2718_v60 = vld [vmem:[%s3722_s17 + $0x18] sm:$0xff] (!%p2294_p5)  }
 0x2f0   : > { %2467 = vmatpush3.bf16.msra.mxu1 %v2674_v61  ;;  %2482 = vmatprep.mubr.msk.bf16.mxu1 %vm2976_vm0, %v2975_v4  ;;  %v2719_v61 = vld [vmem:[%s3722_s17 + $0x20] sm:$0xff] (!%p2294_p5)  }
 0x2f1   : > { %2468 = vmatprep.subr.bf16.mxu1 %v2975_v4 }
 0x2f4   : > { %2469 = vmatpush3.bf16.msra.mxu1 %v2675_v62  ;;  %v2720_v62 = vld [vmem:[%s3722_s17 + $0x28] sm:$0xff] (!%p2294_p5)  }
 0x2f5   : > { %2470 = vmatprep.subr.bf16.mxu1 %v2975_v4 }
 0x2f8   : > { %2471 = vmatpush3.bf16.msra.mxu1 %v2676_v63  ;;  %v2721_v63 = vld [vmem:[%s3722_s17 + $0x30] sm:$0xff] (!%p2294_p5)  }
 0x2f9   : > { %2472 = vmatprep.subr.bf16.mxu1 %v2975_v4 }
 0x2fc   : > { %2473 = vmatpush3.bf16.msra.mxu1 %v2677_v0  ;;  %v2722_v0 = vld [vmem:[%s3722_s17 + $0x38] sm:$0xff] (!%p2294_p5)  }
 0x2fd   : > { %2474 = vmatprep.subr.bf16.mxu1 %v2975_v4 }
 0x300   : > { %2475 = vmatpush3.bf16.msra.mxu1 %v2678_v1  ;;  %v2295_v1 = vld [vmem:[%s3723_s5] ss:$0 sm:$0xff] (!%p2294_p5) }
 0x301   : > { %2476 = vmatprep.subr.bf16.mxu1 %v2975_v4 }
 0x304   : > { %2477 = vmatpush3.bf16.msra.mxu1 %v2679_v2 }
 0x305   : > { %2478 = vmatprep.subr.bf16.mxu1 %v2975_v4 }
 0x308   : > { %2479 = vmatpush3.bf16.msra.mxu1 %v2680_v3 }
 0x309   : > { %2480 = vmatprep.subr.bf16.mxu1 %v2975_v4 }
 0x30c   : > { %2481 = vmatpush3.bf16.msra.mxu1 %v2681_v5 }
 0x30d   : > { %2526 = vmatprep.subr.bf16.mxu1 (!%p2294_p5), %v2979_v47 }
 0x362   : > { %v1738_v55 = vpop.permute.xlu0 (!%p2294_p5), %1737 }
 0x3c2   : > { %v1480_v6 = vpop.f32.mrb[8].mxu1 }
 0x3c3   : > { %v1492_v7 = vpack.c.bf16 %v1480_v6, %v1480_v6  ;;  %v2464_v8 = vpop.f32.mrb[9].mxu1 }
 0x3c4   : > { %v1483_v9 = vpop.f32.mrb[10].mxu1 }
 0x3c5   : > { %v2465_v10 = vpop.f32.mrb[11].mxu1  ;;  %2483 = vmatmul.mubr.bf16.vlgmr.msra.gmra.mrb[12].mxu1 %v1492_v7 }
 0x3c6   : > { %2542 = vmatprep.mubr.msk.bf16.mxu1 (!%p2294_p5), %vm2980_vm8, %v2979_v47  ;;  %2527 = vmatpush3.bf16.msra.mxu1 (!%p2294_p5), %v2715_v58 }
 0x3c7   : > { %2528 = vmatprep.subr.bf16.mxu1 (!%p2294_p5), %v2979_v47 }
 0x3ca   : > { %2529 = vmatpush3.bf16.msra.mxu1 (!%p2294_p5), %v2716_v59 }
 0x3cb   : > { %2530 = vmatprep.subr.bf16.mxu1 (!%p2294_p5), %v2979_v47 }
 0x3ce   : > { %2531 = vmatpush3.bf16.msra.mxu1 (!%p2294_p5), %v2717_v38 }
 0x3cf   : > { %2532 = vmatprep.subr.bf16.mxu1 (!%p2294_p5), %v2979_v47 }
 0x3d2   : > { %2533 = vmatpush3.bf16.msra.mxu1 (!%p2294_p5), %v2718_v60 }
 0x3d3   : > { %2534 = vmatprep.subr.bf16.mxu1 (!%p2294_p5), %v2979_v47 }
 0x3d6   : > { %2535 = vmatpush3.bf16.msra.mxu1 (!%p2294_p5), %v2719_v61 }
 0x3d7   : > { %2536 = vmatprep.subr.bf16.mxu1 (!%p2294_p5), %v2979_v47 }
 0x3da   : > { %2537 = vmatpush3.bf16.msra.mxu1 (!%p2294_p5), %v2720_v62 }
 0x3db   : > { %2538 = vmatprep.subr.bf16.mxu1 (!%p2294_p5), %v2979_v47 }
 0x3de   : > { %2539 = vmatpush3.bf16.msra.mxu1 (!%p2294_p5), %v2721_v63 }
 0x3df   : > { %2540 = vmatprep.subr.bf16.mxu1 (!%p2294_p5), %v2979_v47 }
 0x3e2   : > { %2541 = vmatpush3.bf16.msra.mxu1 (!%p2294_p5), %v2722_v0 }
 0x498   : > { %v1598_v20 = vpop.f32.mrb[12].mxu1 }
 0x499   : > { %v1599_v21 = vadd.f32 %v2275_v19, %v1598_v20  ;;  %v2484_v22 = vpop.f32.mrb[13].mxu1  ;;  %v2305_v19 = vld [vmem:[#allocation5] ss:$0 sm:$0xff] (!%p2294_p5) }
 0x49a   : > { %v1601_v23 = vpop.f32.mrb[14].mxu1 }
 0x49b   : > { %v1605_v24 = vand.u32 2147483647, %v1599_v21  ;;  %v2485_v25 = vpop.f32.mrb[15].mxu1  ;;  %v1604_v31 = vmax.f32 %v1599_v21, 0.0 }
 0x49d   : > { %v1606_v26 = vsub.f32 0.0, %v1605_v24 }
 0x49f   : > { %v1607_v27 = vmul.f32 1.442695, %v1606_v26 }
 0x4a1   : > { %2702 = vpow2.f32 %v1607_v27 }
 0x4ab   : > { %v2703_v29 = vpop.eup %2702 }
 0x4ac   : > { %v1609_v30 = vadd.f32 1.0, %v2703_v29 }
 0x4ae   : > { %2704 = vlog2.f32 %v1609_v30 }
 0x4b8   : > { %v2705_v4 = vpop.eup %2704 }
 0x4b9   : > { %v1611_v32 = vmul.f32 0.6931472, %v2705_v4 }
 0x4bb   : > { %v1612_v33 = vadd.f32 %v1611_v32, %v1604_v31 }
 0x4bd   : > { %v2284_v34 = vadd.f32 -0.6931472, %v1612_v33 }
 0x4bf   : > { %v1614_v35 = vpack.c.bf16 %v2284_v34, %v2284_v34 }
 0x4c1   : > { %2503 = vmatmul.mubr.bf16.vlgmr.msra.gmra.mrb[8].mxu0 %v1614_v35 }
 0x4c2   : > { %2507 = vmatpush3.bf16.msra.mxu0 (!%p2294_p5), %v2707_v45  ;;  %2522 = vmatprep.mubr.msk.bf16.mxu0 (!%p2294_p5), %vm2980_vm8, %v2979_v47 }
 0x4c3   : > { %2508 = vmatprep.subr.bf16.mxu0 (!%p2294_p5), %v2979_v47 }
 0x4c6   : > { %2509 = vmatpush3.bf16.msra.mxu0 (!%p2294_p5), %v2708_v48 }
 0x4c7   : > { %2510 = vmatprep.subr.bf16.mxu0 (!%p2294_p5), %v2979_v47 }
 0x593   : > { %1732 = sbr.rel (%p2294_p5) target bundleno = 1924 (0x784), region = 136 }
 0x594   : > { %v1720_v37 = vpop.f32.mrb[8].mxu0 }
 0x595   : > { %v1721_v39 = vadd.f32 %v2285_v36, %v1720_v37  ;;  %v2504_v40 = vpop.f32.mrb[9].mxu0 }
 0x596   : > { %v1723_v41 = vpop.f32.mrb[10].mxu0 }
 0x597   : > { %v1727_v42 = vadd.f32 %v1721_v39, %v3483_v28  ;;  %v2505_v43 = vpop.f32.mrb[11].mxu0  ;;  %v2709_v28 = vld [vmem:[#allocation14 + $0x10] sm:$0xff] (!%p2294_p5)  }
 0x598   : > { %2511 = vmatpush3.bf16.msra.mxu0 (!%p2294_p5), %v2709_v28 }
 0x599   : > { %1728 = vst [vmem:[#allocation2] sm:$0xff] %v1727_v42  ;;  %2512 = vmatprep.subr.bf16.mxu0 (!%p2294_p5), %v2979_v47 }
 0x59c   : > { %2513 = vmatpush3.bf16.msra.mxu0 %v2710_v49 }
 0x59d   : > { %2514 = vmatprep.subr.bf16.mxu0 %v2979_v47 }
 0x5a0   : > { %2515 = vmatpush3.bf16.msra.mxu0 %v2711_v50  ;;  %v1733_v54 = vld [vmem:[#allocation2] sm:$0xff] }
 0x5a1   : > { %2516 = vmatprep.subr.bf16.mxu0 %v2979_v47  ;;  %v1740_v56 = vmul.f32 %v1738_v55, %v1733_v54 }
 0x5a3   : > { %v1741_v57 = vpack.c.bf16 %v1740_v56, %v1740_v56 }
 0x5a4   : > { %2517 = vmatpush3.bf16.msra.mxu0 %v2712_v51 }
 0x5a5   : > { %2518 = vmatprep.subr.bf16.mxu0 %v2979_v47 }
 0x5a8   : > { %2519 = vmatpush3.bf16.msra.mxu0 %v2713_v52 }
 0x5a9   : > { %2520 = vmatprep.subr.bf16.mxu0 %v2979_v47 }
 0x5ac   : > { %2521 = vmatpush3.bf16.msra.mxu0 %v2714_v53 }
 0x5af   : > { %2523 = vmatmul.mubr.bf16.vlgmr.msra.gmra.mrb[0].mxu0 %v1741_v57 }
 0x682   : > { %v1847_v2 = vpop.f32.mrb[0].mxu0 }
 0x683   : > { %v1848_v3 = vadd.f32 %v2295_v1, %v1847_v2  ;;  %v2524_v5 = vpop.f32.mrb[1].mxu0 }
 0x684   : > { %v1850_v6 = vpop.f32.mrb[2].mxu0 }
 0x685   : > { %v1854_v7 = vand.u32 2147483647, %v1848_v3  ;;  %v2525_v8 = vpop.f32.mrb[3].mxu0  ;;  %v1853_v14 = vmax.f32 %v1848_v3, 0.0 }
 0x687   : > { %v1855_v9 = vsub.f32 0.0, %v1854_v7 }
 0x689   : > { %v1856_v10 = vmul.f32 1.442695, %v1855_v9 }
 0x68b   : > { %2723 = vpow2.f32 %v1856_v10 }
 0x695   : > { %v2724_v11 = vpop.eup %2723 }
 0x696   : > { %v1858_v12 = vadd.f32 1.0, %v2724_v11 }
 0x698   : > { %2725 = vlog2.f32 %v1858_v12 }
 0x6a2   : > { %v2726_v13 = vpop.eup %2725 }
 0x6a3   : > { %v1860_v15 = vmul.f32 0.6931472, %v2726_v13 }
 0x6a5   : > { %v1861_v16 = vadd.f32 %v1860_v15, %v1853_v14 }
 0x6a7   : > { %v2304_v17 = vadd.f32 -0.6931472, %v1861_v16 }
 0x6a9   : > { %v1863_v18 = vpack.c.bf16 %v2304_v17, %v2304_v17 }
 0x6ab   : > { %2543 = vmatmul.mubr.bf16.vlgmr.msra.gmra.mrb[0].mxu1 %v1863_v18 }
 0x77e   : > { %v1969_v20 = vpop.f32.mrb[0].mxu1 }
 0x77f   : > { %v1970_v21 = vadd.f32 %v2305_v19, %v1969_v20  ;;  %v2544_v22 = vpop.f32.mrb[1].mxu1 }
 0x780   : > { %v1972_v23 = vpop.f32.mrb[2].mxu1 }
 0x781   : > { %v1975_v24 = vmul.f32 %v1970_v21, %v3572_v44  ;;  %v2545_v25 = vpop.f32.mrb[3].mxu1 }
 0x783   : > { %1977 = vst.msk [vmem:[%s3724_s1] sm:$0xff] %vm1976_vm9, %v1975_v24 }
 0x784 PF: > { %s39_s23 = sadd.s32 1, %s2965_s23   ;;  %s3725_s13 = sld [smem:[#allocation20_spill]] }
 0x785   : > { %p36_p11 = scmp.ge.s32.totalorder %s39_s23, 4   ;;  %s3726_s1 = sld [smem:[#allocation23_spill]] }
 0x786   : > { %s3727_s22 = sld [smem:[#allocation21_spill]]  ;;  %s3728_s2 = sld [smem:[#allocation22_spill]] }
 0x787   : > { %s3729_s20 = smov %s2949_s21  ;;  %38 = sbr.rel (!%p36_p11) target bundleno = 26 (0x1a), region = 217 }
 0x78a   : > { %s3730_s21 = smov %s3725_s13 }
 0x78e   :  { %1989 = vsyncpa [#allocation7], 1 }
 0x78f   :  { %1991 = vsyncpa [#allocation7 + $0x1], 1 }
 0x790   :  { %1992 = vsyncpa [#allocation9], 1 }
 0x791   :  { %1994 = vsyncpa [#allocation9 + $0x1], 1 }
 0x792   :  { %1995 = vsyncpa [#allocation12], 1 }
 0x793   :  { %1997 = vsyncpa [#allocation12 + $0x1], 1 }
 0x794   :  { %1998 = vsyncpa [#allocation15], 1 }

</bundles_post_ra>
